<compile_context>
chip_gen: v7x
topology: tpu7x:2x2x1
jax: 0.10.0
libtpu: 0.0.40
codegen_flags: <defaults>
</compile_context>

<pallas_src>
import functools

import jax
import jax.numpy as jnp
from jax.experimental import pallas as pl
from jax.experimental.pallas import tpu as pltpu


# ----------------------------------------------------------------------------
# Packed-weight slab layouts (row offsets, shared by init and the kernel)
# ----------------------------------------------------------------------------

def _wbig_layout():
    """64-lane slab: conv2, conv3, RNN weights + their 64-wide biases."""
    o, r = {}, 0
    for name, n in (("w2", 512), ("w3", 576), ("wrnn", 128),
                    ("b2", 1), ("b3", 1), ("brnn", 1)):
        o[name] = (r, n)
        r += n
    return o, ((r + 7) // 8) * 8


def _wsml_layout(k1, a_pad, hidden):
    """32-lane slab: conv1, action_fc, fc-head weights + 32-wide biases."""
    o, r = {}, 0
    for name, n in (("w1", k1), ("wa1", a_pad), ("wa2", 32),
                    ("wf1r", hidden), ("wf1a", 32), ("wf2", 32), ("wf3", 1),
                    ("b1", 1), ("ba1", 1), ("ba2", 1),
                    ("bf1", 1), ("bf2", 1), ("bf3", 1)):
        o[name] = (r, n)
        r += n
    return o, ((r + 7) // 8) * 8


# ----------------------------------------------------------------------------
# The single fused kernel
# ----------------------------------------------------------------------------

def _dqn_kernel(p1_ref, act_ref, h0_ref, wbig_ref, wsml_ref,      # inputs
                out_ref, hn_ref,                                   # outputs
                p2_sc, y2_sc, p3_sc, rnn_sc,                       # VMEM scratch
                *, B, n_sampled, tap_rows, big, sml, hidden):
    f32 = jnp.float32
    BN = B * n_sampled

    def rd(ref, layout, name):
        s, n = layout[name]
        return ref[s:s + n, :]

    # ---- conv1 (patches arrive duplicated per conv2 tap) + ReLU -------------
    y1 = jnp.dot(p1_ref[...], rd(wsml_ref, sml, "w1"),
                 preferred_element_type=f32)
    y1 = jnp.maximum(y1 + rd(wsml_ref, sml, "b1"), 0.0)   # (16*tap_rows, 32)

    # ---- conv2 im2col in VMEM: tap t's rows -> lane block t of p2 -----------
    for t in range(16):
        p2_sc[:, t * 32:(t + 1) * 32] = y1[t * tap_rows:(t + 1) * tap_rows, :]

    y2 = jnp.dot(p2_sc[...], rd(wbig_ref, big, "w2"), preferred_element_type=f32)
    y2_sc[...] = jnp.maximum(y2 + rd(wbig_ref, big, "b2"), 0.0)   # (tap_rows, 64)

    # ---- conv3 im2col in VMEM: spatial pos j -> lane block j of p3 ----------
    for j in range(9):
        p3_sc[:, j * 64:(j + 1) * 64] = y2_sc[j * B:(j + 1) * B, :]

    c3 = jnp.dot(p3_sc[...], rd(wbig_ref, big, "w3"), preferred_element_type=f32)
    c3 = jnp.maximum(c3 + rd(wbig_ref, big, "b3"), 0.0)           # (B, 64)

    # ---- single-step RNN as ONE matmul on [conv_out, h0] --------------------
    rnn_sc[:, 0:hidden] = c3
    rnn_sc[:, hidden:2 * hidden] = h0_ref[...]
    h_n = jnp.tanh(jnp.dot(rnn_sc[...], rd(wbig_ref, big, "wrnn"),
                           preferred_element_type=f32)
                   + rd(wbig_ref, big, "brnn"))                   # (B, 64)
    hn_ref[...] = h_n

    # ---- action_fc ("x2 on last half of actions" folded into wa1) -----------
    la = jnp.maximum(jnp.dot(act_ref[...], rd(wsml_ref, sml, "wa1"),
                             preferred_element_type=f32)
                     + rd(wsml_ref, sml, "ba1"), 0.0)
    la = jnp.maximum(jnp.dot(la, rd(wsml_ref, sml, "wa2"),
                             preferred_element_type=f32)
                     + rd(wsml_ref, sml, "ba2"), 0.0)             # (BN, 32)

    # ---- fc head: cat([rnn, la]) @ W1 as a split matmul ----------------------
    # expand[q, b] = 1 iff b*N <= q < (b+1)*N   (one-hot, no div/mod)
    qi = jax.lax.broadcasted_iota(jnp.int32, (BN, B), 0)
    bi = jax.lax.broadcasted_iota(jnp.int32, (BN, B), 1) * n_sampled
    expand = ((qi >= bi) & (qi < bi + n_sampled)).astype(f32)      # (BN, B)

    r1 = jnp.dot(h_n, rd(wsml_ref, sml, "wf1r"), preferred_element_type=f32)
    z1 = jnp.maximum(jnp.dot(expand, r1, preferred_element_type=f32)
                     + jnp.dot(la, rd(wsml_ref, sml, "wf1a"),
                               preferred_element_type=f32)
                     + rd(wsml_ref, sml, "bf1"), 0.0)
    z2 = jnp.maximum(jnp.dot(z1, rd(wsml_ref, sml, "wf2"),
                             preferred_element_type=f32)
                     + rd(wsml_ref, sml, "bf2"), 0.0)              # (BN, 32)

    # ---- fc3 (32 -> 1): VPU lane reduction, then scatter into (B, N) --------
    s0, _ = sml["bf3"]
    s = (jnp.sum(z2 * rd(wsml_ref, sml, "wf3"), axis=-1, keepdims=True)
         + wsml_ref[s0:s0 + 1, 0:1])                               # (BN, 1)

    # colsel[q, n] = 1 iff q == n + b*N for some b   (static OR over b)
    qn = jax.lax.broadcasted_iota(jnp.int32, (BN, n_sampled), 0)
    ni = jax.lax.broadcasted_iota(jnp.int32, (BN, n_sampled), 1)
    colsel = jnp.zeros((BN, n_sampled), f32)
    for b in range(B):
        colsel = colsel + (qn == ni + b * n_sampled).astype(f32)

    # gather[b, q] = 1 iff b*N <= q < (b+1)*N
    bg = jax.lax.broadcasted_iota(jnp.int32, (B, BN), 0) * n_sampled
    qg = jax.lax.broadcasted_iota(jnp.int32, (B, BN), 1)
    gather = ((qg >= bg) & (qg < bg + n_sampled)).astype(f32)       # (B, BN)

    out_ref[...] = jnp.dot(gather, s * colsel, preferred_element_type=f32)


# ----------------------------------------------------------------------------
# XLA-side patch extraction (strided slices only; output feeds the one kernel)
# ----------------------------------------------------------------------------
# TODO(synk): patch extraction stays in XLA; doing the stride-4 gathers from
# the raw image inside the kernel would need manual DMA gathers for no gain.

def _build_conv_patches(x, tap_rows):
    """x: (B, C, 36, 36) NCHW -> conv1 patches duplicated per conv2 tap.

    Row order: conv2 tap (kh2*4+kw2) major, then (oh2*3+ow2)*B + b, each tap
    block zero-padded to `tap_rows` rows.  Column order: (c, kh1, kw1), i.e.
    the conv1 weight flattening order.
    """
    B, C, _, _ = x.shape
    taps = []
    for kh in range(8):
        for kw in range(8):
            taps.append(x[:, :, kh:kh + 29:4, kw:kw + 29:4])       # (B, C, 8, 8)
    p1 = jnp.stack(taps, axis=-1)                                  # (B, C, 8, 8, 64)
    p1 = p1.transpose(0, 2, 3, 1, 4).reshape(B, 8, 8, C * 64)      # rows (h1, w1)

    blocks = []
    for kh2 in range(4):
        for kw2 in range(4):
            sub = p1[:, kh2:kh2 + 5:2, kw2:kw2 + 5:2, :]           # (B, 3, 3, C*64)
            sub = sub.transpose(1, 2, 0, 3).reshape(9 * B, C * 64)  # rows (oh2,ow2,b)
            blocks.append(jnp.pad(sub, ((0, tap_rows - 9 * B), (0, 0))))
    return jnp.concatenate(blocks, axis=0)                         # (16*tap_rows, C*64)


# ----------------------------------------------------------------------------
# Parameters (PyTorch-style uniform init), packed into two lane-dense slabs
# ----------------------------------------------------------------------------

def init_params(key, in_channels=4, hidden=64, action_size=10):
    assert hidden == 64, "slab packing assumes hidden_shape == 64 (module default)"
    keys = iter(jax.random.split(key, 24))

    def u(shape, fan_in):
        bound = 1.0 / float(fan_in) ** 0.5
        return jax.random.uniform(next(keys), shape, jnp.float32, -bound, bound)

    C = in_channels
    k1 = C * 64
    a_pad = ((action_size + 7) // 8) * 8

    # conv stack (PyTorch layouts), repacked into im2col-matmul order
    c1w = u((32, C, 8, 8), k1);        c1b = u((32,), k1)
    c2w = u((64, 32, 4, 4), 32 * 16);  c2b = u((64,), 32 * 16)
    c3w = u((64, 64, 3, 3), 64 * 9);   c3b = u((64,), 64 * 9)
    w1t = c1w.reshape(32, k1).T                          # rows (c, kh, kw)
    w2t = c2w.transpose(0, 2, 3, 1).reshape(64, 512).T   # rows (kh, kw, c)
    w3t = c3w.transpose(0, 2, 3, 1).reshape(64, 576).T   # rows (kh, kw, c)

    # RNN (single layer, tanh); b_ih + b_hh pre-summed
    conv_out = 64
    wih = u((hidden, conv_out), hidden)
    whh = u((hidden, hidden), hidden)
    brnn = u((hidden,), hidden) + u((hidden,), hidden)
    wrnn = jnp.concatenate([wih.T, whh.T], axis=0)       # (128, 64)

    # action_fc + fc head
    a1w = u((32, action_size), action_size); a1b = u((32,), action_size)
    a2w = u((32, 32), 32);                   a2b = u((32,), 32)
    f1w = u((32, hidden + 32), hidden + 32); f1b = u((32,), hidden + 32)
    f2w = u((32, 32), 32);                   f2b = u((32,), 32)
    f3w = u((1, 32), 32);                    f3b = u((1,), 32)

    # fold "sampled_actions[:, :, A//2:] *= 2" into wa1; pad A -> a_pad rows
    half = action_size // 2
    scale = jnp.concatenate(
        [jnp.ones((half, 1), jnp.float32),
         jnp.full((action_size - half, 1), 2.0, jnp.float32)], axis=0)
    wa1 = jnp.zeros((a_pad, 32), jnp.float32).at[:action_size].set(a1w.T * scale)

    big, big_rows = _wbig_layout()
    wbig = jnp.zeros((big_rows, 64), jnp.float32)
    for name, v in (("w2", w2t), ("w3", w3t), ("wrnn", wrnn),
                    ("b2", c2b[None]), ("b3", c3b[None]), ("brnn", brnn[None])):
        s, n = big[name]
        wbig = wbig.at[s:s + n].set(v)

    sml, sml_rows = _wsml_layout(k1, a_pad, hidden)
    bf3_row = jnp.zeros((1, 32), jnp.float32).at[0, 0].set(f3b[0])
    wsml = jnp.zeros((sml_rows, 32), jnp.float32)
    for name, v in (("w1", w1t), ("wa1", wa1), ("wa2", a2w.T),
                    ("wf1r", f1w.T[:hidden]), ("wf1a", f1w.T[hidden:]),
                    ("wf2", f2w.T), ("wf3", f3w),
                    ("b1", c1b[None]), ("ba1", a1b[None]), ("ba2", a2b[None]),
                    ("bf1", f1b[None]), ("bf2", f2b[None]), ("bf3", bf3_row)):
        s, n = sml[name]
        wsml = wsml.at[s:s + n].set(v)

    return {"wbig": wbig, "wsml": wsml}


# ----------------------------------------------------------------------------
# Forward pass
# ----------------------------------------------------------------------------

def dqn_forward(params, x, sampled_actions, prev_hidden_state):
    """x: (B, C, 36, 36) f32, sampled_actions: (B, N, 10) f32,
    prev_hidden_state: (1, B, 64) f32 -> (out (B, N), h_n (1, B, 64))."""
    B, C, H, W = x.shape
    n_sampled, A = sampled_actions.shape[1], sampled_actions.shape[2]
    hidden = prev_hidden_state.shape[-1]
    # TODO(synk): the fused kernel specializes to inputs where the conv stack's
    # spatial output is 1x1 (36x36 -> 8x8 -> 3x3 -> 1x1), as in the demo.
    assert (H, W) == (36, 36) and hidden == 64

    tap_rows = ((9 * B + 7) // 8) * 8          # conv2 rows per tap, 8-aligned
    a_pad = ((A + 7) // 8) * 8
    k1 = C * 64

    p1 = _build_conv_patches(x, tap_rows)                       # (16*tap_rows, C*64)
    act = jnp.pad(sampled_actions.reshape(B * n_sampled, A),
                  ((0, 0), (0, a_pad - A)))                     # (B*N, a_pad)
    h0 = prev_hidden_state[0]                                   # (B, hidden)

    big, _ = _wbig_layout()
    sml, _ = _wsml_layout(k1, a_pad, hidden)

    kern = functools.partial(_dqn_kernel, B=B, n_sampled=n_sampled,
                             tap_rows=tap_rows, big=big, sml=sml, hidden=hidden)

    # Single invocation (no grid): no pipeline overhead, no double-buffering;
    # every operand is copied once into VMEM (total working set < 1 MiB).
    out, h_n = pl.pallas_call(
        kern,
        out_shape=(jax.ShapeDtypeStruct((B, n_sampled), jnp.float32),
                   jax.ShapeDtypeStruct((B, hidden), jnp.float32)),
        scratch_shapes=[
            pltpu.VMEM((tap_rows, 512), jnp.float32),   # conv2 im2col patches
            pltpu.VMEM((tap_rows, 64), jnp.float32),    # conv2 output
            pltpu.VMEM((B, 576), jnp.float32),          # conv3 im2col patches
            pltpu.VMEM((B, 2 * hidden), jnp.float32),   # [conv_out, h0] RNN input
        ],
    )(p1, act, h0, params["wbig"], params["wsml"])
    return out, h_n[None]                                       # h_n -> (1, B, hidden)


# ----------------------------------------------------------------------------

if __name__ == "__main__":
    # 36x36 images: (36-8)//4+1=8 -> (8-4)//2+1=3 -> (3-3)//1+1=1  => conv_out=64
    B, C, HW = 2, 4, 36
    N_SAMPLED, ACTION_SIZE, HIDDEN = 8, 10, 64

    key = jax.random.PRNGKey(0)
    kp, kx, ka, kh = jax.random.split(key, 4)

    params = init_params(kp, C, HIDDEN, ACTION_SIZE)
    x = jax.random.normal(kx, (B, C, HW, HW), jnp.float32)                # NCHW
    sampled_actions = jax.random.normal(ka, (B, N_SAMPLED, ACTION_SIZE), jnp.float32)
    h0 = jax.random.normal(kh, (1, B, HIDDEN), jnp.float32)

    out, h_n = jax.jit(dqn_forward)(params, x, sampled_actions, h0)
    jax.block_until_ready((out, h_n))

    assert out.shape == (B, N_SAMPLED), out.shape
    assert h_n.shape == (1, B, HIDDEN), h_n.shape
    print("KERNEL_OK")
</pallas_src>

<mosaic_0001>
module attributes {stable_mosaic.version = 11 : i64} {
  func.func @_dqn_kernel(%arg0: memref<384x256xf32, #tpu.memory_space<vmem>>, %arg1: memref<16x16xf32, #tpu.memory_space<vmem>>, %arg2: memref<2x64xf32, #tpu.memory_space<vmem>>, %arg3: memref<1224x64xf32, #tpu.memory_space<vmem>>, %arg4: memref<440x32xf32, #tpu.memory_space<vmem>>, %arg5: memref<2x8xf32, #tpu.memory_space<vmem>>, %arg6: memref<2x64xf32, #tpu.memory_space<vmem>>, %arg7: memref<24x512xf32, #tpu.memory_space<vmem>>, %arg8: memref<24x64xf32, #tpu.memory_space<vmem>>, %arg9: memref<2x576xf32, #tpu.memory_space<vmem>>, %arg10: memref<2x128xf32, #tpu.memory_space<vmem>>) attributes {dimension_semantics = [], scalar_prefetch = 0 : i64, scratch_operands = 4 : i64, tpu.core_type = #tpu.core_type<tc>} {
    %c0 = arith.constant 0 : index
    %c0_0 = arith.constant 0 : index
    %0 = vector.load %arg0[%c0, %c0_0] : memref<384x256xf32, #tpu.memory_space<vmem>>, vector<384x256xf32>
    %c0_1 = arith.constant 0 : index
    %c0_2 = arith.constant 0 : index
    %1 = vector.load %arg4[%c0_1, %c0_2] : memref<440x32xf32, #tpu.memory_space<vmem>>, vector<256x32xf32>
    %cst = arith.constant dense<0.000000e+00> : vector<384x32xf32>
    %2 = tpu.matmul %0, %1, %cst {dimension_numbers = #tpu.dot_dimension_numbers<[1], [0], [0], [1], [0, 0, 1, 1], [], []>} : vector<384x256xf32>, vector<256x32xf32>, vector<384x32xf32> -> vector<384x32xf32>
    %c433 = arith.constant 433 : index
    %c0_3 = arith.constant 0 : index
    %3 = vector.load %arg4[%c433, %c0_3] : memref<440x32xf32, #tpu.memory_space<vmem>>, vector<1x32xf32>
    %4 = vector.broadcast %3 : vector<1x32xf32> to vector<384x32xf32>
    %5 = arith.addf %2, %4 : vector<384x32xf32>
    %cst_4 = arith.constant 0.000000e+00 : f32
    %6 = vector.broadcast %cst_4 : f32 to vector<384x32xf32>
    %7 = arith.maximumf %5, %6 : vector<384x32xf32>
    %8 = vector.extract_strided_slice %7 {offsets = [0, 0], sizes = [24, 32], strides = [1, 1]} : vector<384x32xf32> to vector<24x32xf32>
    %c0_5 = arith.constant 0 : index
    %c0_6 = arith.constant 0 : index
    %9 = vector.load %arg7[%c0_5, %c0_6] : memref<24x512xf32, #tpu.memory_space<vmem>>, vector<24x32xf32>
    tpu.vector_store %arg7[%c0_5, %c0_6], %8 {strides = array<i32>} : memref<24x512xf32, #tpu.memory_space<vmem>>, vector<24x32xf32>,
    %10 = vector.extract_strided_slice %7 {offsets = [24, 0], sizes = [24, 32], strides = [1, 1]} : vector<384x32xf32> to vector<24x32xf32>
    %c0_7 = arith.constant 0 : index
    %c32 = arith.constant 32 : index
    %11 = vector.load %arg7[%c0_7, %c32] : memref<24x512xf32, #tpu.memory_space<vmem>>, vector<24x32xf32>
    tpu.vector_store %arg7[%c0_7, %c32], %10 {strides = array<i32>} : memref<24x512xf32, #tpu.memory_space<vmem>>, vector<24x32xf32>,
    %12 = vector.extract_strided_slice %7 {offsets = [48, 0], sizes = [24, 32], strides = [1, 1]} : vector<384x32xf32> to vector<24x32xf32>
    %c0_8 = arith.constant 0 : index
    %c64 = arith.constant 64 : index
    %13 = vector.load %arg7[%c0_8, %c64] : memref<24x512xf32, #tpu.memory_space<vmem>>, vector<24x32xf32>
    tpu.vector_store %arg7[%c0_8, %c64], %12 {strides = array<i32>} : memref<24x512xf32, #tpu.memory_space<vmem>>, vector<24x32xf32>,
    %14 = vector.extract_strided_slice %7 {offsets = [72, 0], sizes = [24, 32], strides = [1, 1]} : vector<384x32xf32> to vector<24x32xf32>
    %c0_9 = arith.constant 0 : index
    %c96 = arith.constant 96 : index
    %15 = vector.load %arg7[%c0_9, %c96] : memref<24x512xf32, #tpu.memory_space<vmem>>, vector<24x32xf32>
    tpu.vector_store %arg7[%c0_9, %c96], %14 {strides = array<i32>} : memref<24x512xf32, #tpu.memory_space<vmem>>, vector<24x32xf32>,
    %16 = vector.extract_strided_slice %7 {offsets = [96, 0], sizes = [24, 32], strides = [1, 1]} : vector<384x32xf32> to vector<24x32xf32>
    %c0_10 = arith.constant 0 : index
    %c128 = arith.constant 128 : index
    %17 = vector.load %arg7[%c0_10, %c128] : memref<24x512xf32, #tpu.memory_space<vmem>>, vector<24x32xf32>
    tpu.vector_store %arg7[%c0_10, %c128], %16 {strides = array<i32>} : memref<24x512xf32, #tpu.memory_space<vmem>>, vector<24x32xf32>,
    %18 = vector.extract_strided_slice %7 {offsets = [120, 0], sizes = [24, 32], strides = [1, 1]} : vector<384x32xf32> to vector<24x32xf32>
    %c0_11 = arith.constant 0 : index
    %c160 = arith.constant 160 : index
    %19 = vector.load %arg7[%c0_11, %c160] : memref<24x512xf32, #tpu.memory_space<vmem>>, vector<24x32xf32>
    tpu.vector_store %arg7[%c0_11, %c160], %18 {strides = array<i32>} : memref<24x512xf32, #tpu.memory_space<vmem>>, vector<24x32xf32>,
    %20 = vector.extract_strided_slice %7 {offsets = [144, 0], sizes = [24, 32], strides = [1, 1]} : vector<384x32xf32> to vector<24x32xf32>
    %c0_12 = arith.constant 0 : index
    %c192 = arith.constant 192 : index
    %21 = vector.load %arg7[%c0_12, %c192] : memref<24x512xf32, #tpu.memory_space<vmem>>, vector<24x32xf32>
    tpu.vector_store %arg7[%c0_12, %c192], %20 {strides = array<i32>} : memref<24x512xf32, #tpu.memory_space<vmem>>, vector<24x32xf32>,
    %22 = vector.extract_strided_slice %7 {offsets = [168, 0], sizes = [24, 32], strides = [1, 1]} : vector<384x32xf32> to vector<24x32xf32>
    %c0_13 = arith.constant 0 : index
    %c224 = arith.constant 224 : index
    %23 = vector.load %arg7[%c0_13, %c224] : memref<24x512xf32, #tpu.memory_space<vmem>>, vector<24x32xf32>
    tpu.vector_store %arg7[%c0_13, %c224], %22 {strides = array<i32>} : memref<24x512xf32, #tpu.memory_space<vmem>>, vector<24x32xf32>,
    %24 = vector.extract_strided_slice %7 {offsets = [192, 0], sizes = [24, 32], strides = [1, 1]} : vector<384x32xf32> to vector<24x32xf32>
    %c0_14 = arith.constant 0 : index
    %c256 = arith.constant 256 : index
    %25 = vector.load %arg7[%c0_14, %c256] : memref<24x512xf32, #tpu.memory_space<vmem>>, vector<24x32xf32>
    tpu.vector_store %arg7[%c0_14, %c256], %24 {strides = array<i32>} : memref<24x512xf32, #tpu.memory_space<vmem>>, vector<24x32xf32>,
    %26 = vector.extract_strided_slice %7 {offsets = [216, 0], sizes = [24, 32], strides = [1, 1]} : vector<384x32xf32> to vector<24x32xf32>
    %c0_15 = arith.constant 0 : index
    %c288 = arith.constant 288 : index
    %27 = vector.load %arg7[%c0_15, %c288] : memref<24x512xf32, #tpu.memory_space<vmem>>, vector<24x32xf32>
    tpu.vector_store %arg7[%c0_15, %c288], %26 {strides = array<i32>} : memref<24x512xf32, #tpu.memory_space<vmem>>, vector<24x32xf32>,
    %28 = vector.extract_strided_slice %7 {offsets = [240, 0], sizes = [24, 32], strides = [1, 1]} : vector<384x32xf32> to vector<24x32xf32>
    %c0_16 = arith.constant 0 : index
    %c320 = arith.constant 320 : index
    %29 = vector.load %arg7[%c0_16, %c320] : memref<24x512xf32, #tpu.memory_space<vmem>>, vector<24x32xf32>
    tpu.vector_store %arg7[%c0_16, %c320], %28 {strides = array<i32>} : memref<24x512xf32, #tpu.memory_space<vmem>>, vector<24x32xf32>,
    %30 = vector.extract_strided_slice %7 {offsets = [264, 0], sizes = [24, 32], strides = [1, 1]} : vector<384x32xf32> to vector<24x32xf32>
    %c0_17 = arith.constant 0 : index
    %c352 = arith.constant 352 : index
    %31 = vector.load %arg7[%c0_17, %c352] : memref<24x512xf32, #tpu.memory_space<vmem>>, vector<24x32xf32>
    tpu.vector_store %arg7[%c0_17, %c352], %30 {strides = array<i32>} : memref<24x512xf32, #tpu.memory_space<vmem>>, vector<24x32xf32>,
    %32 = vector.extract_strided_slice %7 {offsets = [288, 0], sizes = [24, 32], strides = [1, 1]} : vector<384x32xf32> to vector<24x32xf32>
    %c0_18 = arith.constant 0 : index
    %c384 = arith.constant 384 : index
    %33 = vector.load %arg7[%c0_18, %c384] : memref<24x512xf32, #tpu.memory_space<vmem>>, vector<24x32xf32>
    tpu.vector_store %arg7[%c0_18, %c384], %32 {strides = array<i32>} : memref<24x512xf32, #tpu.memory_space<vmem>>, vector<24x32xf32>,
    %34 = vector.extract_strided_slice %7 {offsets = [312, 0], sizes = [24, 32], strides = [1, 1]} : vector<384x32xf32> to vector<24x32xf32>
    %c0_19 = arith.constant 0 : index
    %c416 = arith.constant 416 : index
    %35 = vector.load %arg7[%c0_19, %c416] : memref<24x512xf32, #tpu.memory_space<vmem>>, vector<24x32xf32>
    tpu.vector_store %arg7[%c0_19, %c416], %34 {strides = array<i32>} : memref<24x512xf32, #tpu.memory_space<vmem>>, vector<24x32xf32>,
    %36 = vector.extract_strided_slice %7 {offsets = [336, 0], sizes = [24, 32], strides = [1, 1]} : vector<384x32xf32> to vector<24x32xf32>
    %c0_20 = arith.constant 0 : index
    %c448 = arith.constant 448 : index
    %37 = vector.load %arg7[%c0_20, %c448] : memref<24x512xf32, #tpu.memory_space<vmem>>, vector<24x32xf32>
    tpu.vector_store %arg7[%c0_20, %c448], %36 {strides = array<i32>} : memref<24x512xf32, #tpu.memory_space<vmem>>, vector<24x32xf32>,
    %38 = vector.extract_strided_slice %7 {offsets = [360, 0], sizes = [24, 32], strides = [1, 1]} : vector<384x32xf32> to vector<24x32xf32>
    %c0_21 = arith.constant 0 : index
    %c480 = arith.constant 480 : index
    %39 = vector.load %arg7[%c0_21, %c480] : memref<24x512xf32, #tpu.memory_space<vmem>>, vector<24x32xf32>
    tpu.vector_store %arg7[%c0_21, %c480], %38 {strides = array<i32>} : memref<24x512xf32, #tpu.memory_space<vmem>>, vector<24x32xf32>,
    %c0_22 = arith.constant 0 : index
    %c0_23 = arith.constant 0 : index
    %40 = vector.load %arg7[%c0_22, %c0_23] : memref<24x512xf32, #tpu.memory_space<vmem>>, vector<24x512xf32>
    %c0_24 = arith.constant 0 : index
    %c0_25 = arith.constant 0 : index
    %41 = vector.load %arg3[%c0_24, %c0_25] : memref<1224x64xf32, #tpu.memory_space<vmem>>, vector<512x64xf32>
    %cst_26 = arith.constant dense<0.000000e+00> : vector<24x64xf32>
    %42 = tpu.matmul %40, %41, %cst_26 {dimension_numbers = #tpu.dot_dimension_numbers<[1], [0], [0], [1], [0, 0, 1, 1], [], []>} : vector<24x512xf32>, vector<512x64xf32>, vector<24x64xf32> -> vector<24x64xf32>
    %c1216 = arith.constant 1216 : index
    %c0_27 = arith.constant 0 : index
    %43 = vector.load %arg3[%c1216, %c0_27] : memref<1224x64xf32, #tpu.memory_space<vmem>>, vector<1x64xf32>
    %44 = vector.broadcast %43 : vector<1x64xf32> to vector<24x64xf32>
    %45 = arith.addf %42, %44 : vector<24x64xf32>
    %cst_28 = arith.constant 0.000000e+00 : f32
    %46 = vector.broadcast %cst_28 : f32 to vector<24x64xf32>
    %47 = arith.maximumf %45, %46 : vector<24x64xf32>
    %c0_29 = arith.constant 0 : index
    %c0_30 = arith.constant 0 : index
    %48 = vector.load %arg8[%c0_29, %c0_30] : memref<24x64xf32, #tpu.memory_space<vmem>>, vector<24x64xf32>
    tpu.vector_store %arg8[%c0_29, %c0_30], %47 {strides = array<i32>} : memref<24x64xf32, #tpu.memory_space<vmem>>, vector<24x64xf32>,
    %c0_31 = arith.constant 0 : index
    %c0_32 = arith.constant 0 : index
    %49 = vector.load %arg8[%c0_31, %c0_32] : memref<24x64xf32, #tpu.memory_space<vmem>>, vector<2x64xf32>
    %c0_33 = arith.constant 0 : index
    %c0_34 = arith.constant 0 : index
    %50 = vector.load %arg9[%c0_33, %c0_34] : memref<2x576xf32, #tpu.memory_space<vmem>>, vector<2x64xf32>
    tpu.vector_store %arg9[%c0_33, %c0_34], %49 {strides = array<i32>} : memref<2x576xf32, #tpu.memory_space<vmem>>, vector<2x64xf32>,
    %c2 = arith.constant 2 : index
    %c0_35 = arith.constant 0 : index
    %51 = vector.load %arg8[%c2, %c0_35] : memref<24x64xf32, #tpu.memory_space<vmem>>, vector<2x64xf32>
    %c0_36 = arith.constant 0 : index
    %c64_37 = arith.constant 64 : index
    %52 = vector.load %arg9[%c0_36, %c64_37] : memref<2x576xf32, #tpu.memory_space<vmem>>, vector<2x64xf32>
    tpu.vector_store %arg9[%c0_36, %c64_37], %51 {strides = array<i32>} : memref<2x576xf32, #tpu.memory_space<vmem>>, vector<2x64xf32>,
    %c4 = arith.constant 4 : index
    %c0_38 = arith.constant 0 : index
    %53 = vector.load %arg8[%c4, %c0_38] : memref<24x64xf32, #tpu.memory_space<vmem>>, vector<2x64xf32>
    %c0_39 = arith.constant 0 : index
    %c128_40 = arith.constant 128 : index
    %54 = vector.load %arg9[%c0_39, %c128_40] : memref<2x576xf32, #tpu.memory_space<vmem>>, vector<2x64xf32>
    tpu.vector_store %arg9[%c0_39, %c128_40], %53 {strides = array<i32>} : memref<2x576xf32, #tpu.memory_space<vmem>>, vector<2x64xf32>,
    %c6 = arith.constant 6 : index
    %c0_41 = arith.constant 0 : index
    %55 = vector.load %arg8[%c6, %c0_41] : memref<24x64xf32, #tpu.memory_space<vmem>>, vector<2x64xf32>
    %c0_42 = arith.constant 0 : index
    %c192_43 = arith.constant 192 : index
    %56 = vector.load %arg9[%c0_42, %c192_43] : memref<2x576xf32, #tpu.memory_space<vmem>>, vector<2x64xf32>
    tpu.vector_store %arg9[%c0_42, %c192_43], %55 {strides = array<i32>} : memref<2x576xf32, #tpu.memory_space<vmem>>, vector<2x64xf32>,
    %c8 = arith.constant 8 : index
    %c0_44 = arith.constant 0 : index
    %57 = vector.load %arg8[%c8, %c0_44] : memref<24x64xf32, #tpu.memory_space<vmem>>, vector<2x64xf32>
    %c0_45 = arith.constant 0 : index
    %c256_46 = arith.constant 256 : index
    %58 = vector.load %arg9[%c0_45, %c256_46] : memref<2x576xf32, #tpu.memory_space<vmem>>, vector<2x64xf32>
    tpu.vector_store %arg9[%c0_45, %c256_46], %57 {strides = array<i32>} : memref<2x576xf32, #tpu.memory_space<vmem>>, vector<2x64xf32>,
    %c10 = arith.constant 10 : index
    %c0_47 = arith.constant 0 : index
    %59 = vector.load %arg8[%c10, %c0_47] : memref<24x64xf32, #tpu.memory_space<vmem>>, vector<2x64xf32>
    %c0_48 = arith.constant 0 : index
    %c320_49 = arith.constant 320 : index
    %60 = vector.load %arg9[%c0_48, %c320_49] : memref<2x576xf32, #tpu.memory_space<vmem>>, vector<2x64xf32>
    tpu.vector_store %arg9[%c0_48, %c320_49], %59 {strides = array<i32>} : memref<2x576xf32, #tpu.memory_space<vmem>>, vector<2x64xf32>,
    %c12 = arith.constant 12 : index
    %c0_50 = arith.constant 0 : index
    %61 = vector.load %arg8[%c12, %c0_50] : memref<24x64xf32, #tpu.memory_space<vmem>>, vector<2x64xf32>
    %c0_51 = arith.constant 0 : index
    %c384_52 = arith.constant 384 : index
    %62 = vector.load %arg9[%c0_51, %c384_52] : memref<2x576xf32, #tpu.memory_space<vmem>>, vector<2x64xf32>
    tpu.vector_store %arg9[%c0_51, %c384_52], %61 {strides = array<i32>} : memref<2x576xf32, #tpu.memory_space<vmem>>, vector<2x64xf32>,
    %c14 = arith.constant 14 : index
    %c0_53 = arith.constant 0 : index
    %63 = vector.load %arg8[%c14, %c0_53] : memref<24x64xf32, #tpu.memory_space<vmem>>, vector<2x64xf32>
    %c0_54 = arith.constant 0 : index
    %c448_55 = arith.constant 448 : index
    %64 = vector.load %arg9[%c0_54, %c448_55] : memref<2x576xf32, #tpu.memory_space<vmem>>, vector<2x64xf32>
    tpu.vector_store %arg9[%c0_54, %c448_55], %63 {strides = array<i32>} : memref<2x576xf32, #tpu.memory_space<vmem>>, vector<2x64xf32>,
    %c16 = arith.constant 16 : index
    %c0_56 = arith.constant 0 : index
    %65 = vector.load %arg8[%c16, %c0_56] : memref<24x64xf32, #tpu.memory_space<vmem>>, vector<2x64xf32>
    %c0_57 = arith.constant 0 : index
    %c512 = arith.constant 512 : index
    %66 = vector.load %arg9[%c0_57, %c512] : memref<2x576xf32, #tpu.memory_space<vmem>>, vector<2x64xf32>
    tpu.vector_store %arg9[%c0_57, %c512], %65 {strides = array<i32>} : memref<2x576xf32, #tpu.memory_space<vmem>>, vector<2x64xf32>,
    %c0_58 = arith.constant 0 : index
    %c0_59 = arith.constant 0 : index
    %67 = vector.load %arg9[%c0_58, %c0_59] : memref<2x576xf32, #tpu.memory_space<vmem>>, vector<2x576xf32>
    %c512_60 = arith.constant 512 : index
    %c0_61 = arith.constant 0 : index
    %68 = vector.load %arg3[%c512_60, %c0_61] : memref<1224x64xf32, #tpu.memory_space<vmem>>, vector<576x64xf32>
    %cst_62 = arith.constant dense<0.000000e+00> : vector<2x64xf32>
    %69 = tpu.matmul %67, %68, %cst_62 {dimension_numbers = #tpu.dot_dimension_numbers<[1], [0], [0], [1], [0, 0, 1, 1], [], []>} : vector<2x576xf32>, vector<576x64xf32>, vector<2x64xf32> -> vector<2x64xf32>
    %c1217 = arith.constant 1217 : index
    %c0_63 = arith.constant 0 : index
    %70 = vector.load %arg3[%c1217, %c0_63] : memref<1224x64xf32, #tpu.memory_space<vmem>>, vector<1x64xf32>
    %71 = vector.broadcast %70 : vector<1x64xf32> to vector<2x64xf32>
    %72 = arith.addf %69, %71 : vector<2x64xf32>
    %cst_64 = arith.constant 0.000000e+00 : f32
    %73 = vector.broadcast %cst_64 : f32 to vector<2x64xf32>
    %74 = arith.maximumf %72, %73 : vector<2x64xf32>
    %c0_65 = arith.constant 0 : index
    %c0_66 = arith.constant 0 : index
    %75 = vector.load %arg10[%c0_65, %c0_66] : memref<2x128xf32, #tpu.memory_space<vmem>>, vector<2x64xf32>
    tpu.vector_store %arg10[%c0_65, %c0_66], %74 {strides = array<i32>} : memref<2x128xf32, #tpu.memory_space<vmem>>, vector<2x64xf32>,
    %c0_67 = arith.constant 0 : index
    %c0_68 = arith.constant 0 : index
    %76 = vector.load %arg2[%c0_67, %c0_68] : memref<2x64xf32, #tpu.memory_space<vmem>>, vector<2x64xf32>
    %c0_69 = arith.constant 0 : index
    %c64_70 = arith.constant 64 : index
    %77 = vector.load %arg10[%c0_69, %c64_70] : memref<2x128xf32, #tpu.memory_space<vmem>>, vector<2x64xf32>
    tpu.vector_store %arg10[%c0_69, %c64_70], %76 {strides = array<i32>} : memref<2x128xf32, #tpu.memory_space<vmem>>, vector<2x64xf32>,
    %c0_71 = arith.constant 0 : index
    %c0_72 = arith.constant 0 : index
    %78 = vector.load %arg10[%c0_71, %c0_72] : memref<2x128xf32, #tpu.memory_space<vmem>>, vector<2x128xf32>
    %c1088 = arith.constant 1088 : index
    %c0_73 = arith.constant 0 : index
    %79 = vector.load %arg3[%c1088, %c0_73] : memref<1224x64xf32, #tpu.memory_space<vmem>>, vector<128x64xf32>
    %cst_74 = arith.constant dense<0.000000e+00> : vector<2x64xf32>
    %80 = tpu.matmul %78, %79, %cst_74 {dimension_numbers = #tpu.dot_dimension_numbers<[1], [0], [0], [1], [0, 0, 1, 1], [], []>} : vector<2x128xf32>, vector<128x64xf32>, vector<2x64xf32> -> vector<2x64xf32>
    %c1218 = arith.constant 1218 : index
    %c0_75 = arith.constant 0 : index
    %81 = vector.load %arg3[%c1218, %c0_75] : memref<1224x64xf32, #tpu.memory_space<vmem>>, vector<1x64xf32>
    %82 = vector.broadcast %81 : vector<1x64xf32> to vector<2x64xf32>
    %83 = arith.addf %80, %82 : vector<2x64xf32>
    %84 = math.tanh %83 : vector<2x64xf32>
    %c0_76 = arith.constant 0 : index
    %c0_77 = arith.constant 0 : index
    %85 = vector.load %arg6[%c0_76, %c0_77] : memref<2x64xf32, #tpu.memory_space<vmem>>, vector<2x64xf32>
    tpu.vector_store %arg6[%c0_76, %c0_77], %84 {strides = array<i32>} : memref<2x64xf32, #tpu.memory_space<vmem>>, vector<2x64xf32>,
    %c0_78 = arith.constant 0 : index
    %c0_79 = arith.constant 0 : index
    %86 = vector.load %arg1[%c0_78, %c0_79] : memref<16x16xf32, #tpu.memory_space<vmem>>, vector<16x16xf32>
    %c256_80 = arith.constant 256 : index
    %c0_81 = arith.constant 0 : index
    %87 = vector.load %arg4[%c256_80, %c0_81] : memref<440x32xf32, #tpu.memory_space<vmem>>, vector<16x32xf32>
    %cst_82 = arith.constant dense<0.000000e+00> : vector<16x32xf32>
    %88 = tpu.matmul %86, %87, %cst_82 {dimension_numbers = #tpu.dot_dimension_numbers<[1], [0], [0], [1], [0, 0, 1, 1], [], []>} : vector<16x16xf32>, vector<16x32xf32>, vector<16x32xf32> -> vector<16x32xf32>
    %c434 = arith.constant 434 : index
    %c0_83 = arith.constant 0 : index
    %89 = vector.load %arg4[%c434, %c0_83] : memref<440x32xf32, #tpu.memory_space<vmem>>, vector<1x32xf32>
    %90 = vector.broadcast %89 : vector<1x32xf32> to vector<16x32xf32>
    %91 = arith.addf %88, %90 : vector<16x32xf32>
    %cst_84 = arith.constant 0.000000e+00 : f32
    %92 = vector.broadcast %cst_84 : f32 to vector<16x32xf32>
    %93 = arith.maximumf %91, %92 : vector<16x32xf32>
    %c272 = arith.constant 272 : index
    %c0_85 = arith.constant 0 : index
    %94 = vector.load %arg4[%c272, %c0_85] : memref<440x32xf32, #tpu.memory_space<vmem>>, vector<32x32xf32>
    %cst_86 = arith.constant dense<0.000000e+00> : vector<16x32xf32>
    %95 = tpu.matmul %93, %94, %cst_86 {dimension_numbers = #tpu.dot_dimension_numbers<[1], [0], [0], [1], [0, 0, 1, 1], [], []>} : vector<16x32xf32>, vector<32x32xf32>, vector<16x32xf32> -> vector<16x32xf32>
    %c435 = arith.constant 435 : index
    %c0_87 = arith.constant 0 : index
    %96 = vector.load %arg4[%c435, %c0_87] : memref<440x32xf32, #tpu.memory_space<vmem>>, vector<1x32xf32>
    %97 = vector.broadcast %96 : vector<1x32xf32> to vector<16x32xf32>
    %98 = arith.addf %95, %97 : vector<16x32xf32>
    %cst_88 = arith.constant 0.000000e+00 : f32
    %99 = vector.broadcast %cst_88 : f32 to vector<16x32xf32>
    %100 = arith.maximumf %98, %99 : vector<16x32xf32>
    %101 = tpu.iota {dimensions = array<i32: 0>} : vector<16x2xi32>
    %102 = tpu.iota {dimensions = array<i32: 1>} : vector<16x2xi32>
    %c8_i32 = arith.constant 8 : i32
    %103 = vector.broadcast %c8_i32 : i32 to vector<16x2xi32>
    %104 = arith.muli %102, %103 : vector<16x2xi32>
    %105 = arith.cmpi sge, %101, %104 : vector<16x2xi32>
    %c8_i32_89 = arith.constant 8 : i32
    %106 = vector.broadcast %c8_i32_89 : i32 to vector<16x2xi32>
    %107 = arith.addi %104, %106 : vector<16x2xi32>
    %108 = arith.cmpi slt, %101, %107 : vector<16x2xi32>
    %109 = arith.andi %105, %108 : vector<16x2xi1>
    %110 = arith.extui %109 : vector<16x2xi1> to vector<16x2xi32>
    %111 = arith.sitofp %110 : vector<16x2xi32> to vector<16x2xf32>
    %c304 = arith.constant 304 : index
    %c0_90 = arith.constant 0 : index
    %112 = vector.load %arg4[%c304, %c0_90] : memref<440x32xf32, #tpu.memory_space<vmem>>, vector<64x32xf32>
    %cst_91 = arith.constant dense<0.000000e+00> : vector<2x32xf32>
    %113 = tpu.matmul %84, %112, %cst_91 {dimension_numbers = #tpu.dot_dimension_numbers<[1], [0], [0], [1], [0, 0, 1, 1], [], []>} : vector<2x64xf32>, vector<64x32xf32>, vector<2x32xf32> -> vector<2x32xf32>
    %cst_92 = arith.constant dense<0.000000e+00> : vector<16x32xf32>
    %114 = tpu.matmul %111, %113, %cst_92 {dimension_numbers = #tpu.dot_dimension_numbers<[1], [0], [0], [1], [0, 0, 1, 1], [], []>} : vector<16x2xf32>, vector<2x32xf32>, vector<16x32xf32> -> vector<16x32xf32>
    %c368 = arith.constant 368 : index
    %c0_93 = arith.constant 0 : index
    %115 = vector.load %arg4[%c368, %c0_93] : memref<440x32xf32, #tpu.memory_space<vmem>>, vector<32x32xf32>
    %cst_94 = arith.constant dense<0.000000e+00> : vector<16x32xf32>
    %116 = tpu.matmul %100, %115, %cst_94 {dimension_numbers = #tpu.dot_dimension_numbers<[1], [0], [0], [1], [0, 0, 1, 1], [], []>} : vector<16x32xf32>, vector<32x32xf32>, vector<16x32xf32> -> vector<16x32xf32>
    %117 = arith.addf %114, %116 : vector<16x32xf32>
    %c436 = arith.constant 436 : index
    %c0_95 = arith.constant 0 : index
    %118 = vector.load %arg4[%c436, %c0_95] : memref<440x32xf32, #tpu.memory_space<vmem>>, vector<1x32xf32>
    %119 = vector.broadcast %118 : vector<1x32xf32> to vector<16x32xf32>
    %120 = arith.addf %117, %119 : vector<16x32xf32>
    %cst_96 = arith.constant 0.000000e+00 : f32
    %121 = vector.broadcast %cst_96 : f32 to vector<16x32xf32>
    %122 = arith.maximumf %120, %121 : vector<16x32xf32>
    %c400 = arith.constant 400 : index
    %c0_97 = arith.constant 0 : index
    %123 = vector.load %arg4[%c400, %c0_97] : memref<440x32xf32, #tpu.memory_space<vmem>>, vector<32x32xf32>
    %cst_98 = arith.constant dense<0.000000e+00> : vector<16x32xf32>
    %124 = tpu.matmul %122, %123, %cst_98 {dimension_numbers = #tpu.dot_dimension_numbers<[1], [0], [0], [1], [0, 0, 1, 1], [], []>} : vector<16x32xf32>, vector<32x32xf32>, vector<16x32xf32> -> vector<16x32xf32>
    %c437 = arith.constant 437 : index
    %c0_99 = arith.constant 0 : index
    %125 = vector.load %arg4[%c437, %c0_99] : memref<440x32xf32, #tpu.memory_space<vmem>>, vector<1x32xf32>
    %126 = vector.broadcast %125 : vector<1x32xf32> to vector<16x32xf32>
    %127 = arith.addf %124, %126 : vector<16x32xf32>
    %cst_100 = arith.constant 0.000000e+00 : f32
    %128 = vector.broadcast %cst_100 : f32 to vector<16x32xf32>
    %129 = arith.maximumf %127, %128 : vector<16x32xf32>
    %c432 = arith.constant 432 : index
    %c0_101 = arith.constant 0 : index
    %130 = vector.load %arg4[%c432, %c0_101] : memref<440x32xf32, #tpu.memory_space<vmem>>, vector<1x32xf32>
    %131 = vector.broadcast %130 : vector<1x32xf32> to vector<16x32xf32>
    %132 = arith.mulf %129, %131 : vector<16x32xf32>
    %cst_102 = arith.constant dense<0.000000e+00> : vector<16xf32>
    %133 = vector.multi_reduction <add>, %132, %cst_102 [1] : vector<16x32xf32> to vector<16xf32>
    %134 = vector.shape_cast %133 : vector<16xf32> to vector<16x1xf32>
    %c438 = arith.constant 438 : index
    %c0_103 = arith.constant 0 : index
    %135 = vector.load %arg4[%c438, %c0_103] : memref<440x32xf32, #tpu.memory_space<vmem>>, vector<1x1xf32>
    %136 = vector.broadcast %135 : vector<1x1xf32> to vector<16x1xf32>
    %137 = arith.addf %134, %136 : vector<16x1xf32>
    %138 = tpu.iota {dimensions = array<i32: 0>} : vector<16x8xi32>
    %139 = tpu.iota {dimensions = array<i32: 1>} : vector<16x8xi32>
    %cst_104 = arith.constant 0.000000e+00 : f32
    %140 = vector.broadcast %cst_104 : f32 to vector<16x8xf32>
    %c0_i32 = arith.constant 0 : i32
    %141 = vector.broadcast %c0_i32 : i32 to vector<16x8xi32>
    %142 = arith.addi %139, %141 : vector<16x8xi32>
    %143 = arith.cmpi eq, %138, %142 : vector<16x8xi32>
    %144 = arith.extui %143 : vector<16x8xi1> to vector<16x8xi32>
    %145 = arith.sitofp %144 : vector<16x8xi32> to vector<16x8xf32>
    %146 = arith.addf %140, %145 : vector<16x8xf32>
    %c8_i32_105 = arith.constant 8 : i32
    %147 = vector.broadcast %c8_i32_105 : i32 to vector<16x8xi32>
    %148 = arith.addi %139, %147 : vector<16x8xi32>
    %149 = arith.cmpi eq, %138, %148 : vector<16x8xi32>
    %150 = arith.extui %149 : vector<16x8xi1> to vector<16x8xi32>
    %151 = arith.sitofp %150 : vector<16x8xi32> to vector<16x8xf32>
    %152 = arith.addf %146, %151 : vector<16x8xf32>
    %153 = tpu.iota {dimensions = array<i32: 0>} : vector<2x16xi32>
    %c8_i32_106 = arith.constant 8 : i32
    %154 = vector.broadcast %c8_i32_106 : i32 to vector<2x16xi32>
    %155 = arith.muli %153, %154 : vector<2x16xi32>
    %156 = tpu.iota {dimensions = array<i32: 1>} : vector<2x16xi32>
    %157 = arith.cmpi sge, %156, %155 : vector<2x16xi32>
    %c8_i32_107 = arith.constant 8 : i32
    %158 = vector.broadcast %c8_i32_107 : i32 to vector<2x16xi32>
    %159 = arith.addi %155, %158 : vector<2x16xi32>
    %160 = arith.cmpi slt, %156, %159 : vector<2x16xi32>
    %161 = arith.andi %157, %160 : vector<2x16xi1>
    %162 = arith.extui %161 : vector<2x16xi1> to vector<2x16xi32>
    %163 = arith.sitofp %162 : vector<2x16xi32> to vector<2x16xf32>
    %164 = vector.broadcast %137 : vector<16x1xf32> to vector<16x8xf32>
    %165 = arith.mulf %164, %152 : vector<16x8xf32>
    %cst_108 = arith.constant dense<0.000000e+00> : vector<2x8xf32>
    %166 = tpu.matmul %163, %165, %cst_108 {dimension_numbers = #tpu.dot_dimension_numbers<[1], [0], [0], [1], [0, 0, 1, 1], [], []>} : vector<2x16xf32>, vector<16x8xf32>, vector<2x8xf32> -> vector<2x8xf32>
    %c0_109 = arith.constant 0 : index
    %c0_110 = arith.constant 0 : index
    %167 = vector.load %arg5[%c0_109, %c0_110] : memref<2x8xf32, #tpu.memory_space<vmem>>, vector<2x8xf32>
    tpu.vector_store %arg5[%c0_109, %c0_110], %166 {strides = array<i32>} : memref<2x8xf32, #tpu.memory_space<vmem>>, vector<2x8xf32>,
    return
  }
}

</mosaic_0001>

<bundles_post_ra>
// kernel: dqn_forward.1
= control target key start
LH: loop header
LB: loop body
LE: loop exit
PB: predicated region body
PF: predicated region fallthrough
CT: control target
= control target key end

     0   :  { %12 = vsyncpa [#allocation7], 0  ;;  %v2850_v3 = vmov 0.0|0.0   ;;  %s4121_s0 = inlined_call_operand.vmem [shape: f32[384,256], index: 0, kind: input, shape index: {}]   ;;  %s4122_s1 = inlined_call_operand.vmem [shape: f32[16,16], index: 1, kind: input, shape index: {}]   ;;  %s4123_s2 = inlined_call_operand.vmem [shape: f32[2,64], index: 2, kind: input, shape index: {}]   ;;  %s4124_s3 = inlined_call_operand.vmem [shape: f32[1224,64], index: 3, kind: input, shape index: {}]   ;;  %s4125_s4 = inlined_call_operand.vmem [shape: f32[440,32], index: 4, kind: input, shape index: {}]   ;;  %s4126_s5 = inlined_call_operand.hbm [shape: f32[2,8], index: 5, kind: output, shape index: {0}]   ;;  %s4127_s6 = inlined_call_operand.hbm [shape: f32[2,64], index: 6, kind: output, shape index: {1}]  }
   0x1   :  { %v120_v0 = vld [vmem:[%s4125_s4] sm:$0xff]  ;;  %v121_v1 = vld [vmem:[%s4125_s4 + $0x8] sm:$0xff]  ;;  %v122_v2 = vld [vmem:[%s4125_s4 + $0x10] sm:$0xff]  ;;  %2530 = vmatprep.subr.bf16.mxu0 %v2850_v3 }
   0x2   :  { %v2531_v4 = vpack.c.bf16 %v121_v1, %v120_v0  ;;  %v123_v5 = vld [vmem:[%s4125_s4 + $0x18] sm:$0xff]  ;;  %v124_v7 = vld [vmem:[%s4125_s4 + $0x20] sm:$0xff]  ;;  %v125_v8 = vld [vmem:[%s4125_s4 + $0x28] sm:$0xff] }
   0x3   :  { %v2534_v6 = vpack.c.bf16 %v123_v5, %v122_v2  ;;  %v2537_v9 = vpack.c.bf16 %v125_v8, %v124_v7  ;;  %v126_v10 = vld [vmem:[%s4125_s4 + $0x30] sm:$0xff]  ;;  %v127_v11 = vld [vmem:[%s4125_s4 + $0x38] sm:$0xff]  ;;  %v25_v12 = vld [vmem:[%s4121_s0 + $0x8] sm:$0xff] }
   0x4   :  { %2532 = vmatpush1.bf16.msra.mxu0 %v2531_v4  ;;  %v2540_v13 = vpack.c.bf16 %v127_v11, %v126_v10  ;;  %221 = vmatprep.mubr.f32.mxu0 %v25_v12  ;;  %v128_v14 = vld [vmem:[%s4125_s4 + $0x40] sm:$0xff]  ;;  %v129_v15 = vld [vmem:[%s4125_s4 + $0x48] sm:$0xff]  ;;  %v130_v17 = vld [vmem:[%s4125_s4 + $0x50] sm:$0xff] }
   0x5   :  { %2533 = vmatprep.subr.bf16.mxu0 %v2850_v3  ;;  %v2543_v16 = vpack.c.bf16 %v129_v15, %v128_v14  ;;  %v131_v18 = vld [vmem:[%s4125_s4 + $0x58] sm:$0xff]  ;;  %v132_v20 = vld [vmem:[%s4125_s4 + $0x60] sm:$0xff]  ;;  %v133_v21 = vld [vmem:[%s4125_s4 + $0x68] sm:$0xff] }
   0x6   :  { %v2546_v19 = vpack.c.bf16 %v131_v18, %v130_v17  ;;  %v2549_v22 = vpack.c.bf16 %v133_v21, %v132_v20  ;;  %v134_v23 = vld [vmem:[%s4125_s4 + $0x70] sm:$0xff]  ;;  %v135_v24 = vld [vmem:[%s4125_s4 + $0x78] sm:$0xff] }
   0x8   :  { %2535 = vmatpush1.bf16.msra.mxu0 %v2534_v6 }
   0x9   :  { %2536 = vmatprep.subr.bf16.mxu0 %v2850_v3 }
   0xc   :  { %2538 = vmatpush1.bf16.msra.mxu0 %v2537_v9 }
   0xd   :  { %2539 = vmatprep.subr.bf16.mxu0 %v2850_v3 }
  0x10   :  { %2541 = vmatpush1.bf16.msra.mxu0 %v2540_v13 }
  0x11   :  { %2542 = vmatprep.subr.bf16.mxu0 %v2850_v3 }
  0x14   :  { %2544 = vmatpush1.bf16.msra.mxu0 %v2543_v16 }
  0x15   :  { %2545 = vmatprep.subr.bf16.mxu0 %v2850_v3 }
  0x18   :  { %2547 = vmatpush1.bf16.msra.mxu0 %v2546_v19 }
  0x19   :  { %2548 = vmatprep.subr.bf16.mxu0 %v2850_v3 }
  0x1a   :  { %13 = vsyncpa [#allocation9], 0  ;;  %v2552_v25 = vpack.c.bf16 %v135_v24, %v134_v23  ;;  %v136_v26 = vld [vmem:[%s4125_s4 + $0x80] sm:$0xff]  ;;  %v137_v27 = vld [vmem:[%s4125_s4 + $0x88] sm:$0xff]  ;;  %vm510_vm0 = vcmask 261120   ;;  %s2852_s15 = smov 64  }
  0x1b   :  { %v2555_v28 = vpack.c.bf16 %v137_v27, %v136_v26  ;;  %v138_v29 = vld [vmem:[%s4125_s4 + $0x90] sm:$0xff]  ;;  %v139_v30 = vld [vmem:[%s4125_s4 + $0x98] sm:$0xff]  ;;  %v140_v32 = vld [vmem:[%s4125_s4 + $0xa0] sm:$0xff]  ;;  %s2853_s16 = smov 96   ;;  %vm526_vm1 = vcmask 523520   ;;  %vm542_vm2 = vcmask 785920  }
  0x1c   :  { %2550 = vmatpush1.bf16.msra.mxu0 %v2549_v22  ;;  %v2558_v31 = vpack.c.bf16 %v139_v30, %v138_v29  ;;  %v141_v33 = vld [vmem:[%s4125_s4 + $0xa8] sm:$0xff]  ;;  %v142_v35 = vld [vmem:[%s4125_s4 + $0xb0] sm:$0xff]  ;;  %v143_v36 = vld [vmem:[%s4125_s4 + $0xb8] sm:$0xff]  ;;  %vm558_vm3 = vcmask 1048320   ;;  %vm950_vm4 = vcmask 523264   ;;  %vm955_vm5 = vcmask 517120  }
  0x1d   :  { %2551 = vmatprep.subr.bf16.mxu0 %v2850_v3  ;;  %v2561_v34 = vpack.c.bf16 %v141_v33, %v140_v32  ;;  %v2564_v37 = vpack.c.bf16 %v143_v36, %v142_v35  ;;  %v144_v38 = vld [vmem:[%s4125_s4 + $0xc0] sm:$0xff]  ;;  %v145_v39 = vld [vmem:[%s4125_s4 + $0xc8] sm:$0xff]  ;;  %v146_v41 = vld [vmem:[%s4125_s4 + $0xd0] sm:$0xff]  ;;  %vm969_vm6 = vcmask 1041920   ;;  %vm2855_vm7 = vmmov 0  }
  0x1e   :  { %v2567_v40 = vpack.c.bf16 %v145_v39, %v144_v38  ;;  %v147_v42 = vld [vmem:[%s4125_s4 + $0xd8] sm:$0xff]  ;;  %v148_v44 = vld [vmem:[%s4125_s4 + $0xe0] sm:$0xff]  ;;  %v149_v45 = vld [vmem:[%s4125_s4 + $0xe8] sm:$0xff]  ;;  %vm1450_vm8 = vcmask 130048   ;;  %vm1809_vm12 = vcmask 15360  }
  0x1f   :  { %v2570_v43 = vpack.c.bf16 %v147_v42, %v146_v41  ;;  %v2573_v46 = vpack.c.bf16 %v149_v45, %v148_v44  ;;  %v150_v47 = vld [vmem:[%s4125_s4 + $0xf0] sm:$0xff]  ;;  %v151_v48 = vld [vmem:[%s4125_s4 + $0xf8] sm:$0xff]  ;;  %v24_v50 = vld [vmem:[%s4121_s0] sm:$0xff] }
  0x20   :  { %2553 = vmatpush1.bf16.msra.mxu0 %v2552_v25  ;;  %v2576_v49 = vpack.c.bf16 %v151_v48, %v150_v47  ;;  %v27_v51 = vld [vmem:[%s4121_s0 + $0x18] sm:$0xff]  ;;  %v26_v52 = vld [vmem:[%s4121_s0 + $0x10] sm:$0xff]  ;;  %v29_v53 = vld [vmem:[%s4121_s0 + $0x28] sm:$0xff] }
  0x21   :  { %2554 = vmatprep.subr.bf16.mxu0 %v2850_v3  ;;  %v28_v54 = vld [vmem:[%s4121_s0 + $0x20] sm:$0xff]  ;;  %v31_v55 = vld [vmem:[%s4121_s0 + $0x38] sm:$0xff]  ;;  %v30_v56 = vld [vmem:[%s4121_s0 + $0x30] sm:$0xff] }
  0x22   :  { %v33_v57 = vld [vmem:[%s4121_s0 + $0x48] sm:$0xff]  ;;  %v32_v58 = vld [vmem:[%s4121_s0 + $0x40] sm:$0xff]  ;;  %v35_v59 = vld [vmem:[%s4121_s0 + $0x58] sm:$0xff] }
  0x23   :  { %v34_v60 = vld [vmem:[%s4121_s0 + $0x50] sm:$0xff]  ;;  %v37_v61 = vld [vmem:[%s4121_s0 + $0x68] sm:$0xff]  ;;  %v36_v62 = vld [vmem:[%s4121_s0 + $0x60] sm:$0xff] }
  0x24   :  { %2556 = vmatpush1.bf16.msra.mxu0 %v2555_v28  ;;  %v39_v63 = vld [vmem:[%s4121_s0 + $0x78] sm:$0xff]  ;;  %v38_v0 = vld [vmem:[%s4121_s0 + $0x70] sm:$0xff]  ;;  %v41_v1 = vld [vmem:[%s4121_s0 + $0x88] sm:$0xff] }
  0x25   :  { %2557 = vmatprep.subr.bf16.mxu0 %v2850_v3  ;;  %v40_v2 = vld [vmem:[%s4121_s0 + $0x80] sm:$0xff]  ;;  %v43_v4 = vld [vmem:[%s4121_s0 + $0x98] sm:$0xff]  ;;  %v42_v5 = vld [vmem:[%s4121_s0 + $0x90] sm:$0xff] }
  0x26   :  { %v45_v6 = vld [vmem:[%s4121_s0 + $0xa8] sm:$0xff]  ;;  %v44_v7 = vld [vmem:[%s4121_s0 + $0xa0] sm:$0xff]  ;;  %v47_v8 = vld [vmem:[%s4121_s0 + $0xb8] sm:$0xff] }
  0x27   :  { %v46_v9 = vld [vmem:[%s4121_s0 + $0xb0] sm:$0xff]  ;;  %v49_v10 = vld [vmem:[%s4121_s0 + $0xc8] sm:$0xff]  ;;  %v48_v11 = vld [vmem:[%s4121_s0 + $0xc0] sm:$0xff] }
  0x28   :  { %2559 = vmatpush1.bf16.msra.mxu0 %v2558_v31  ;;  %v51_v12 = vld [vmem:[%s4121_s0 + $0xd8] sm:$0xff]  ;;  %v50_v13 = vld [vmem:[%s4121_s0 + $0xd0] sm:$0xff]  ;;  %v53_v14 = vld [vmem:[%s4121_s0 + $0xe8] sm:$0xff] }
  0x29   :  { %2560 = vmatprep.subr.bf16.mxu0 %v2850_v3  ;;  %v52_v15 = vld [vmem:[%s4121_s0 + $0xe0] sm:$0xff]  ;;  %v55_v16 = vld [vmem:[%s4121_s0 + $0xf8] sm:$0xff]  ;;  %v54_v17 = vld [vmem:[%s4121_s0 + $0xf0] sm:$0xff] }
  0x2a   :  { %v57_v18 = vld [vmem:[%s4121_s0 + $0x108] sm:$0xff]  ;;  %v56_v19 = vld [vmem:[%s4121_s0 + $0x100] sm:$0xff]  ;;  %v59_v20 = vld [vmem:[%s4121_s0 + $0x118] sm:$0xff] }
  0x2b   :  { %v58_v21 = vld [vmem:[%s4121_s0 + $0x110] sm:$0xff]  ;;  %v61_v22 = vld [vmem:[%s4121_s0 + $0x128] sm:$0xff]  ;;  %v60_v23 = vld [vmem:[%s4121_s0 + $0x120] sm:$0xff] }
  0x2c   :  { %2562 = vmatpush1.bf16.msra.mxu0 %v2561_v34  ;;  %v63_v24 = vld [vmem:[%s4121_s0 + $0x138] sm:$0xff]  ;;  %v62_v25 = vld [vmem:[%s4121_s0 + $0x130] sm:$0xff]  ;;  %v65_v26 = vld [vmem:[%s4121_s0 + $0x148] sm:$0xff] }
  0x2d   :  { %2563 = vmatprep.subr.bf16.mxu0 %v2850_v3  ;;  %v64_v27 = vld [vmem:[%s4121_s0 + $0x140] sm:$0xff]  ;;  %v67_v28 = vld [vmem:[%s4121_s0 + $0x158] sm:$0xff]  ;;  %v66_v29 = vld [vmem:[%s4121_s0 + $0x150] sm:$0xff] }
  0x2e   :  { %v69_v30 = vld [vmem:[%s4121_s0 + $0x168] sm:$0xff]  ;;  %v68_v31 = vld [vmem:[%s4121_s0 + $0x160] sm:$0xff]  ;;  %v71_v32 = vld [vmem:[%s4121_s0 + $0x178] sm:$0xff] }
  0x2f   :  { %v70_v33 = vld [vmem:[%s4121_s0 + $0x170] sm:$0xff]  ;;  %v73_v34 = vld [vmem:[%s4121_s0 + $0x188] sm:$0xff]  ;;  %v72_v35 = vld [vmem:[%s4121_s0 + $0x180] sm:$0xff] }
  0x30   :  { %2565 = vmatpush1.bf16.msra.mxu0 %v2564_v37  ;;  %v75_v36 = vld [vmem:[%s4121_s0 + $0x198] sm:$0xff]  ;;  %v74_v37 = vld [vmem:[%s4121_s0 + $0x190] sm:$0xff]  ;;  %v77_v38 = vld [vmem:[%s4121_s0 + $0x1a8] sm:$0xff] }
  0x31   :  { %2566 = vmatprep.subr.bf16.mxu0 %v2850_v3  ;;  %v76_v39 = vld [vmem:[%s4121_s0 + $0x1a0] sm:$0xff]  ;;  %v78_v41 = vld [vmem:[%s4121_s0 + $0x1b0] sm:$0xff]  ;;  %v81_v42 = vld [vmem:[%s4121_s0 + $0x1c8] sm:$0xff] }
  0x32   :  { %v83_v44 = vld [vmem:[%s4121_s0 + $0x1d8] sm:$0xff]  ;;  %v82_v45 = vld [vmem:[%s4121_s0 + $0x1d0] sm:$0xff]  ;;  %v84_v47 = vld [vmem:[%s4121_s0 + $0x1e0] sm:$0xff] }
  0x33   :  { %v87_v48 = vld [vmem:[%s4121_s0 + $0x1f8] sm:$0xff] }
  0x34   :  { %2568 = vmatpush1.bf16.msra.mxu0 %v2567_v40  ;;  %v79_v40 = vld [vmem:[%s4121_s0 + $0x1b8] sm:$0xff] }
  0x35   :  { %2569 = vmatprep.subr.bf16.mxu0 %v2850_v3 }
  0x38   :  { %2571 = vmatpush1.bf16.msra.mxu0 %v2570_v43  ;;  %v80_v43 = vld [vmem:[%s4121_s0 + $0x1c0] sm:$0xff] }
  0x39   :  { %2572 = vmatprep.subr.bf16.mxu0 %v2850_v3 }
  0x3c   :  { %2574 = vmatpush1.bf16.msra.mxu0 %v2573_v46  ;;  %v85_v46 = vld [vmem:[%s4121_s0 + $0x1e8] sm:$0xff] }
  0x3d   :  { %2575 = vmatprep.subr.bf16.mxu0 %v2850_v3 }
  0x40   :  { %2577 = vmatpush1.bf16.msra.mxu0 %v2576_v49  ;;  %v86_v49 = vld [vmem:[%s4121_s0 + $0x1f0] sm:$0xff] }
  0x43   :  { %222 = vmatmul.mubr.f32.vlgmr.msra.gmra.mrb[0].mxu0 %v24_v50  ;;  %v89_v50 = vld [vmem:[%s4121_s0 + $0x208] sm:$0xff] }
  0x44   :  { %226 = vmatprep.mubr.f32.mxu0 %v27_v51  ;;  %v88_v51 = vld [vmem:[%s4121_s0 + $0x200] sm:$0xff] }
  0x47   :  { %227 = vmatmul.mubr.f32.gmra.mrb[2].mxu0 %v26_v52  ;;  %v91_v52 = vld [vmem:[%s4121_s0 + $0x218] sm:$0xff] }
  0x48   :  { %231 = vmatprep.mubr.f32.mxu0 %v29_v53  ;;  %v90_v53 = vld [vmem:[%s4121_s0 + $0x210] sm:$0xff] }
  0x4b   :  { %232 = vmatmul.mubr.f32.gmra.mrb[4].mxu0 %v28_v54  ;;  %v93_v54 = vld [vmem:[%s4121_s0 + $0x228] sm:$0xff] }
  0x4c   :  { %236 = vmatprep.mubr.f32.mxu0 %v31_v55  ;;  %v92_v55 = vld [vmem:[%s4121_s0 + $0x220] sm:$0xff] }
  0x4f   :  { %237 = vmatmul.mubr.f32.gmra.mrb[6].mxu0 %v30_v56  ;;  %v95_v56 = vld [vmem:[%s4121_s0 + $0x238] sm:$0xff] }
  0x50   :  { %241 = vmatprep.mubr.f32.mxu0 %v33_v57  ;;  %v94_v57 = vld [vmem:[%s4121_s0 + $0x230] sm:$0xff] }
  0x53   :  { %242 = vmatmul.mubr.f32.gmra.mrb[8].mxu0 %v32_v58  ;;  %v97_v58 = vld [vmem:[%s4121_s0 + $0x248] sm:$0xff] }
  0x54   :  { %246 = vmatprep.mubr.f32.mxu0 %v35_v59  ;;  %v96_v59 = vld [vmem:[%s4121_s0 + $0x240] sm:$0xff] }
  0x57   :  { %247 = vmatmul.mubr.f32.gmra.mrb[10].mxu0 %v34_v60  ;;  %v99_v60 = vld [vmem:[%s4121_s0 + $0x258] sm:$0xff] }
  0x58   :  { %251 = vmatprep.mubr.f32.mxu0 %v37_v61  ;;  %v98_v61 = vld [vmem:[%s4121_s0 + $0x250] sm:$0xff] }
  0x5b   :  { %252 = vmatmul.mubr.f32.gmra.mrb[12].mxu0 %v36_v62  ;;  %v101_v62 = vld [vmem:[%s4121_s0 + $0x268] sm:$0xff] }
  0x5c   :  { %256 = vmatprep.mubr.f32.mxu0 %v39_v63  ;;  %v100_v63 = vld [vmem:[%s4121_s0 + $0x260] sm:$0xff] }
  0x5f   :  { %257 = vmatmul.mubr.f32.gmra.mrb[14].mxu0 %v38_v0  ;;  %v103_v0 = vld [vmem:[%s4121_s0 + $0x278] sm:$0xff] }
  0x60   :  { %261 = vmatprep.mubr.f32.mxu0 %v41_v1  ;;  %v102_v1 = vld [vmem:[%s4121_s0 + $0x270] sm:$0xff] }
  0x63   :  { %262 = vmatmul.mubr.f32.gmra.mrb[16].mxu0 %v40_v2  ;;  %v105_v2 = vld [vmem:[%s4121_s0 + $0x288] sm:$0xff] }
  0x64   :  { %266 = vmatprep.mubr.f32.mxu0 %v43_v4  ;;  %v104_v4 = vld [vmem:[%s4121_s0 + $0x280] sm:$0xff] }
  0x67   :  { %267 = vmatmul.mubr.f32.gmra.mrb[18].mxu0 %v42_v5  ;;  %v107_v5 = vld [vmem:[%s4121_s0 + $0x298] sm:$0xff] }
  0x68   :  { %271 = vmatprep.mubr.f32.mxu0 %v45_v6  ;;  %v106_v6 = vld [vmem:[%s4121_s0 + $0x290] sm:$0xff] }
  0x6b   :  { %272 = vmatmul.mubr.f32.gmra.mrb[20].mxu0 %v44_v7  ;;  %v109_v7 = vld [vmem:[%s4121_s0 + $0x2a8] sm:$0xff] }
  0x6c   :  { %276 = vmatprep.mubr.f32.mxu0 %v47_v8  ;;  %v108_v8 = vld [vmem:[%s4121_s0 + $0x2a0] sm:$0xff] }
  0x6f   :  { %277 = vmatmul.mubr.f32.gmra.mrb[22].mxu0 %v46_v9  ;;  %v111_v9 = vld [vmem:[%s4121_s0 + $0x2b8] sm:$0xff] }
  0x70   :  { %281 = vmatprep.mubr.f32.mxu0 %v49_v10  ;;  %v110_v10 = vld [vmem:[%s4121_s0 + $0x2b0] sm:$0xff] }
  0x73   :  { %282 = vmatmul.mubr.f32.gmra.mrb[24].mxu0 %v48_v11  ;;  %v113_v11 = vld [vmem:[%s4121_s0 + $0x2c8] sm:$0xff] }
  0x74   :  { %286 = vmatprep.mubr.f32.mxu0 %v51_v12  ;;  %v112_v12 = vld [vmem:[%s4121_s0 + $0x2c0] sm:$0xff] }
  0x77   :  { %287 = vmatmul.mubr.f32.gmra.mrb[26].mxu0 %v50_v13  ;;  %v115_v13 = vld [vmem:[%s4121_s0 + $0x2d8] sm:$0xff] }
  0x78   :  { %291 = vmatprep.mubr.f32.mxu0 %v53_v14  ;;  %v114_v14 = vld [vmem:[%s4121_s0 + $0x2d0] sm:$0xff] }
  0x7b   :  { %292 = vmatmul.mubr.f32.gmra.mrb[28].mxu0 %v52_v15  ;;  %v117_v15 = vld [vmem:[%s4121_s0 + $0x2e8] sm:$0xff] }
  0x7c   :  { %296 = vmatprep.mubr.f32.mxu0 %v55_v16  ;;  %v116_v16 = vld [vmem:[%s4121_s0 + $0x2e0] sm:$0xff] }
  0x7f   :  { %297 = vmatmul.mubr.f32.gmra.mrb[30].mxu0 %v54_v17  ;;  %v119_v17 = vld [vmem:[%s4121_s0 + $0x2f8] sm:$0xff] }
  0x80   :  { %301 = vmatprep.mubr.f32.mxu0 %v57_v18  ;;  %v118_v18 = vld [vmem:[%s4121_s0 + $0x2f0] sm:$0xff]  ;;  %s2851_s0 = smov 32  }
  0x83   :  { %302 = vmatmul.mubr.f32.gmra.mrb[32].mxu0 %v56_v19  ;;  %v3298_v19 = vld [vmem:[%s4125_s4 + $0x1b1] ss:$0 sm:$0xff] }
  0x84   :  { %306 = vmatprep.mubr.f32.mxu0 %v59_v20 }
  0x87   :  { %307 = vmatmul.mubr.f32.gmra.mrb[34].mxu0 %v58_v21 }
  0x88   :  { %311 = vmatprep.mubr.f32.mxu0 %v61_v22 }
  0x8b   :  { %312 = vmatmul.mubr.f32.gmra.mrb[36].mxu0 %v60_v23 }
  0x8c   :  { %316 = vmatprep.mubr.f32.mxu0 %v63_v24 }
  0x8f   :  { %317 = vmatmul.mubr.f32.gmra.mrb[38].mxu0 %v62_v25 }
  0x90   :  { %321 = vmatprep.mubr.f32.mxu0 %v65_v26 }
  0x93   :  { %322 = vmatmul.mubr.f32.gmra.mrb[40].mxu0 %v64_v27 }
  0x94   :  { %326 = vmatprep.mubr.f32.mxu0 %v67_v28 }
  0x97   :  { %327 = vmatmul.mubr.f32.gmra.mrb[42].mxu0 %v66_v29 }
  0x98   :  { %331 = vmatprep.mubr.f32.mxu0 %v69_v30 }
  0x9b   :  { %332 = vmatmul.mubr.f32.gmra.mrb[44].mxu0 %v68_v31 }
  0x9c   :  { %336 = vmatprep.mubr.f32.mxu0 %v71_v32 }
  0x9f   :  { %337 = vmatmul.mubr.f32.gmra.mrb[46].mxu0 %v70_v33 }
  0xa0   :  { %341 = vmatprep.mubr.f32.mxu0 %v73_v34 }
  0xa3   :  { %342 = vmatmul.mubr.f32.gmra.mrb[48].mxu0 %v72_v35 }
  0xa4   :  { %346 = vmatprep.mubr.f32.mxu0 %v75_v36 }
  0xa7   :  { %347 = vmatmul.mubr.f32.gmra.mrb[50].mxu0 %v74_v37 }
  0xa8   :  { %351 = vmatprep.mubr.f32.mxu0 %v77_v38 }
  0xab   :  { %352 = vmatmul.mubr.f32.gmra.mrb[52].mxu0 %v76_v39 }
  0xac   :  { %356 = vmatprep.mubr.f32.mxu0 %v79_v40 }
  0xaf   :  { %357 = vmatmul.mubr.f32.gmra.mrb[54].mxu0 %v78_v41 }
  0xb0   :  { %361 = vmatprep.mubr.f32.mxu0 %v81_v42 }
  0xb3   :  { %362 = vmatmul.mubr.f32.gmra.mrb[56].mxu0 %v80_v43 }
  0xb4   :  { %366 = vmatprep.mubr.f32.mxu0 %v83_v44 }
  0xb7   :  { %367 = vmatmul.mubr.f32.gmra.mrb[58].mxu0 %v82_v45 }
  0xb8   :  { %371 = vmatprep.mubr.f32.mxu0 %v85_v46 }
  0xbb   :  { %372 = vmatmul.mubr.f32.gmra.mrb[60].mxu0 %v84_v47 }
  0xbc   :  { %376 = vmatprep.mubr.f32.mxu0 %v87_v48 }
  0xbf   :  { %377 = vmatmul.mubr.f32.gmra.mrb[62].mxu0 %v86_v49 }
  0xc0   :  { %381 = vmatprep.mubr.f32.mxu0 %v89_v50 }
  0xc3   :  { %382 = vmatmul.mubr.f32.gmra.mrb[64].mxu0 %v88_v51 }
  0xc4   :  { %386 = vmatprep.mubr.f32.mxu0 %v91_v52 }
  0xc7   :  { %387 = vmatmul.mubr.f32.gmra.mrb[66].mxu0 %v90_v53 }
  0xc8   :  { %391 = vmatprep.mubr.f32.mxu0 %v93_v54 }
  0xcb   :  { %392 = vmatmul.mubr.f32.gmra.mrb[68].mxu0 %v92_v55 }
  0xcc   :  { %396 = vmatprep.mubr.f32.mxu0 %v95_v56 }
  0xcf   :  { %397 = vmatmul.mubr.f32.gmra.mrb[70].mxu0 %v94_v57 }
  0xd0   :  { %401 = vmatprep.mubr.f32.mxu0 %v97_v58 }
  0xd3   :  { %402 = vmatmul.mubr.f32.gmra.mrb[72].mxu0 %v96_v59 }
  0xd4   :  { %406 = vmatprep.mubr.f32.mxu0 %v99_v60 }
  0xd7   :  { %407 = vmatmul.mubr.f32.gmra.mrb[74].mxu0 %v98_v61 }
  0xd8   :  { %411 = vmatprep.mubr.f32.mxu0 %v101_v62 }
  0xdb   :  { %412 = vmatmul.mubr.f32.gmra.mrb[76].mxu0 %v100_v63  ;;  %v734_v63 = vld [vmem:[%s4124_s3 + $0x80] sm:$0xff] }
  0xdc   :  { %416 = vmatprep.mubr.f32.mxu0 %v103_v0  ;;  %v735_v0 = vld [vmem:[%s4124_s3 + $0x88] sm:$0xff] }
  0xdf   :  { %417 = vmatmul.mubr.f32.gmra.mrb[78].mxu0 %v102_v1 }
  0xe0   :  { %421 = vmatprep.mubr.f32.mxu0 %v105_v2  ;;  %v2578_v2 = vpack.c.bf16 %v735_v0, %v734_v63 }
  0xe2   :  { %2579 = vmatprep.subr.bf16.mxu1 %v2578_v2  ;;  %v747_v2 = vld [vmem:[%s4124_s3 + $0xe8] sm:$0xff] }
  0xe3   :  { %422 = vmatmul.mubr.f32.gmra.mrb[80].mxu0 %v104_v4  ;;  %v718_v4 = vld [vmem:[%s4124_s3] sm:$0xff] }
  0xe4   :  { %426 = vmatprep.mubr.f32.mxu0 %v107_v5  ;;  %v719_v5 = vld [vmem:[%s4124_s3 + $0x8] sm:$0xff] }
  0xe7   :  { %427 = vmatmul.mubr.f32.gmra.mrb[82].mxu0 %v106_v6 }
  0xe8   :  { %431 = vmatprep.mubr.f32.mxu0 %v109_v7  ;;  %v2580_v7 = vpack.c.bf16 %v719_v5, %v718_v4 }
  0xea   :  { %2581 = vmatpush3.bf16.msra.mxu1 %v2580_v7  ;;  %v730_v7 = vld [vmem:[%s4124_s3 + $0x60] sm:$0xff] }
  0xeb   :  { %432 = vmatmul.mubr.f32.gmra.mrb[84].mxu0 %v108_v8 }
  0xec   :  { %436 = vmatprep.mubr.f32.mxu0 %v111_v9 }
  0xef   :  { %437 = vmatmul.mubr.f32.gmra.mrb[86].mxu0 %v110_v10  ;;  %v736_v10 = vld [vmem:[%s4124_s3 + $0x90] sm:$0xff] }
  0xf0   :  { %441 = vmatprep.mubr.f32.mxu0 %v113_v11  ;;  %v737_v11 = vld [vmem:[%s4124_s3 + $0x98] sm:$0xff] }
  0xf3   :  { %442 = vmatmul.mubr.f32.gmra.mrb[88].mxu0 %v112_v12 }
  0xf4   :  { %446 = vmatprep.mubr.f32.mxu0 %v115_v13  ;;  %v2582_v13 = vpack.c.bf16 %v737_v11, %v736_v10 }
  0xf6   :  { %2583 = vmatprep.subr.bf16.mxu1 %v2582_v13  ;;  %v749_v13 = vld [vmem:[%s4124_s3 + $0xf8] sm:$0xff] }
  0xf7   :  { %447 = vmatmul.mubr.f32.gmra.mrb[90].mxu0 %v114_v14  ;;  %v720_v14 = vld [vmem:[%s4124_s3 + $0x10] sm:$0xff] }
  0xf8   :  { %451 = vmatprep.mubr.f32.mxu0 %v117_v15  ;;  %v721_v15 = vld [vmem:[%s4124_s3 + $0x18] sm:$0xff] }
  0xfb   :  { %452 = vmatmul.mubr.f32.gmra.mrb[92].mxu0 %v116_v16 }
  0xfc   :  { %456 = vmatprep.mubr.f32.mxu0 %v119_v17  ;;  %v2584_v17 = vpack.c.bf16 %v721_v15, %v720_v14 }
  0xfe   :  { %2585 = vmatpush3.bf16.msra.mxu1 %v2584_v17 }
  0xff   :  { %457 = vmatmul.mubr.f32.gmra.mrb[94].mxu0 %v118_v18 }
 0x116   :  { %v223_v20 = vpop.f32.mrb[0].mxu0 }
 0x117   :  { %v224_v21 = vadd.f32 %v3298_v19, %v223_v20  ;;  %v225_v22 = vpop.f32.mrb[1].mxu0 }
 0x118   :  { %v739_v22 = vld [vmem:[%s4124_s3 + $0xa8] sm:$0xff] }
 0x119   :  { %v462_v23 = vmax.f32 %v224_v21, 0.0  ;;  %v738_v21 = vld [vmem:[%s4124_s3 + $0xa0] sm:$0xff] }
 0x11a   :  { %v228_v24 = vpop.f32.mrb[2].mxu0 }
 0x11b   :  { %511 = vst.msk [vmem:[#allocation2] sm:$0xff] %vm510_vm0, %v462_v23  ;;  %v229_v25 = vadd.f32 %v3298_v19, %v228_v24  ;;  %v230_v26 = vpop.f32.mrb[3].mxu0  ;;  %v2586_v24 = vpack.c.bf16 %v739_v22, %v738_v21 }
 0x11c   :  { %v723_v26 = vld [vmem:[%s4124_s3 + $0x28] sm:$0xff] }
 0x11d   :  { %v463_v27 = vmax.f32 %v229_v25, 0.0  ;;  %v722_v25 = vld [vmem:[%s4124_s3 + $0x20] sm:$0xff]  ;;  %2587 = vmatprep.subr.bf16.mxu1 %v2586_v24 }
 0x11e   :  { %v233_v28 = vpop.f32.mrb[4].mxu0 }
 0x11f   :  { %512 = vst.msk [vmem:[#allocation2 + $0x20] sm:$0xff] %vm510_vm0, %v463_v27  ;;  %v234_v29 = vadd.f32 %v3298_v19, %v233_v28  ;;  %v235_v30 = vpop.f32.mrb[5].mxu0  ;;  %v2588_v28 = vpack.c.bf16 %v723_v26, %v722_v25 }
 0x121   :  { %v464_v31 = vmax.f32 %v234_v29, 0.0  ;;  %2589 = vmatpush3.bf16.msra.mxu1 %v2588_v28 }
 0x122   :  { %v238_v32 = vpop.f32.mrb[6].mxu0 }
 0x123   :  { %513 = vst.msk [vmem:[#allocation2 + $0x40] sm:$0xff] %vm510_vm0, %v464_v31  ;;  %v239_v33 = vadd.f32 %v3298_v19, %v238_v32  ;;  %v240_v34 = vpop.f32.mrb[7].mxu0  ;;  %v740_v31 = vld [vmem:[%s4124_s3 + $0xb0] sm:$0xff]  ;;  %v741_v32 = vld [vmem:[%s4124_s3 + $0xb8] sm:$0xff] }
 0x124   :  { %v2590_v34 = vpack.c.bf16 %v741_v32, %v740_v31 }
 0x125   :  { %v465_v35 = vmax.f32 %v239_v33, 0.0 }
 0x126   :  { %v243_v36 = vpop.f32.mrb[8].mxu0  ;;  %2591 = vmatprep.subr.bf16.mxu1 %v2590_v34 }
 0x127   :  { %v244_v37 = vadd.f32 %v3298_v19, %v243_v36  ;;  %v245_v38 = vpop.f32.mrb[9].mxu0  ;;  %517 = vrot.lane.b32.xlu0 %v465_v35, %s2851_s0  ;;  %v724_v35 = vld [vmem:[%s4124_s3 + $0x30] sm:$0xff]  ;;  %v725_v36 = vld [vmem:[%s4124_s3 + $0x38] sm:$0xff] }
 0x128   :  { %v2592_v38 = vpack.c.bf16 %v725_v36, %v724_v35 }
 0x129   :  { %v466_v39 = vmax.f32 %v244_v37, 0.0 }
 0x12a   :  { %v3309_v40 = vpop.f32.mrb[10].mxu0  ;;  %2593 = vmatpush3.bf16.msra.mxu1 %v2592_v38 }
 0x12b   :  { %v250_v41 = vpop.f32.mrb[11].mxu0  ;;  %519 = vrot.lane.b32.xlu1 %v466_v39, %s2851_s0  ;;  %v249_v14 = vadd.f32 %v3298_v19, %v3309_v40 }
 0x12d   :  { %v467_v40 = vmax.f32 %v249_v14, 0.0 }
 0x12e   :  { %v253_v42 = vpop.f32.mrb[12].mxu0 }
 0x12f   :  { %v254_v43 = vadd.f32 %v3298_v19, %v253_v42  ;;  %v255_v44 = vpop.f32.mrb[13].mxu0  ;;  %v742_v42 = vld [vmem:[%s4124_s3 + $0xc0] sm:$0xff] }
 0x131   :  { %v468_v45 = vmax.f32 %v254_v43, 0.0  ;;  %v743_v43 = vld [vmem:[%s4124_s3 + $0xc8] sm:$0xff] }
 0x132   :  { %v258_v46 = vpop.f32.mrb[14].mxu0 }
 0x133   :  { %v259_v47 = vadd.f32 %v3298_v19, %v258_v46  ;;  %v260_v48 = vpop.f32.mrb[15].mxu0  ;;  %533 = vrot.lane.b32.xlu1 %v468_v45, %s2852_s15  ;;  %v2594_v45 = vpack.c.bf16 %v743_v43, %v742_v42  ;;  %v726_v46 = vld [vmem:[%s4124_s3 + $0x40] sm:$0xff] }
 0x135   :  { %v469_v49 = vmax.f32 %v259_v47, 0.0  ;;  %v727_v47 = vld [vmem:[%s4124_s3 + $0x48] sm:$0xff]  ;;  %2595 = vmatprep.subr.bf16.mxu1 %v2594_v45 }
 0x136   :  { %v3315_v50 = vpop.f32.mrb[16].mxu0 }
 0x137   :  { %v265_v51 = vpop.f32.mrb[17].mxu0  ;;  %535 = vrot.lane.b32.xlu1 %v469_v49, %s2852_s15  ;;  %v2596_v49 = vpack.c.bf16 %v727_v47, %v726_v46  ;;  %v264_v24 = vadd.f32 %v3298_v19, %v3315_v50 }
 0x139   :  { %2597 = vmatpush3.bf16.msra.mxu1 %v2596_v49  ;;  %v470_v28 = vmax.f32 %v264_v24, 0.0 }
 0x13a   :  { %v268_v52 = vpop.f32.mrb[18].mxu0 }
 0x13b   :  { %v269_v53 = vadd.f32 %v3298_v19, %v268_v52  ;;  %v270_v54 = vpop.f32.mrb[19].mxu0 }
 0x13c   :  { %v745_v54 = vld [vmem:[%s4124_s3 + $0xd8] sm:$0xff] }
 0x13d   :  { %v471_v55 = vmax.f32 %v269_v53, 0.0  ;;  %v744_v53 = vld [vmem:[%s4124_s3 + $0xd0] sm:$0xff] }
 0x13e   :  { %v3319_v56 = vpop.f32.mrb[20].mxu0 }
 0x13f   :  { %v275_v57 = vpop.f32.mrb[21].mxu0  ;;  %549 = vrot.lane.b32.xlu1 %v471_v55, %s2853_s16  ;;  %v274_v4 = vadd.f32 %v3298_v19, %v3319_v56  ;;  %v748_v56 = vld [vmem:[%s4124_s3 + $0xf0] sm:$0xff] }
 0x140   :  { %v2598_v57 = vpack.c.bf16 %v745_v54, %v744_v53  ;;  %v2606_v17 = vpack.c.bf16 %v749_v13, %v748_v56 }
 0x141   :  { %v472_v15 = vmax.f32 %v274_v4, 0.0 }
 0x142   :  { %v3322_v58 = vpop.f32.mrb[22].mxu0  ;;  %2599 = vmatprep.subr.bf16.mxu1 %v2598_v57 }
 0x143   :  { %v280_v59 = vpop.f32.mrb[23].mxu0 }
 0x144   :  { %v728_v59 = vld [vmem:[%s4124_s3 + $0x50] sm:$0xff] }
 0x146   :  { %v283_v60 = vpop.f32.mrb[24].mxu0 }
 0x147   :  { %v284_v61 = vadd.f32 %v3298_v19, %v283_v60  ;;  %v285_v62 = vpop.f32.mrb[25].mxu0  ;;  %v729_v60 = vld [vmem:[%s4124_s3 + $0x58] sm:$0xff] }
 0x148   :  { %v2600_v62 = vpack.c.bf16 %v729_v60, %v728_v59 }
 0x149   :  { %v474_v1 = vmax.f32 %v284_v61, 0.0 }
 0x14a   :  { %v288_v6 = vpop.f32.mrb[26].mxu0  ;;  %2601 = vmatpush3.bf16.msra.mxu1 %v2600_v62 }
 0x14b   :  { %562 = vst.msk [vmem:[#allocation2 + $0x8] sm:$0xff] %vm510_vm0, %v474_v1  ;;  %v289_v8 = vadd.f32 %v3298_v19, %v288_v6  ;;  %v290_v9 = vpop.f32.mrb[27].mxu0  ;;  %v746_v1 = vld [vmem:[%s4124_s3 + $0xe0] sm:$0xff] }
 0x14c   :  { %v2602_v6 = vpack.c.bf16 %v747_v2, %v746_v1 }
 0x14d   :  { %v475_v12 = vmax.f32 %v289_v8, 0.0  ;;  %v731_v8 = vld [vmem:[%s4124_s3 + $0x68] sm:$0xff] }
 0x14e   :  { %v293_v16 = vpop.f32.mrb[28].mxu0  ;;  %v2604_v10 = vpack.c.bf16 %v731_v8, %v730_v7  ;;  %2603 = vmatprep.subr.bf16.mxu1 %v2602_v6 }
 0x14f   :  { %563 = vst.msk [vmem:[#allocation2 + $0x28] sm:$0xff] %vm510_vm0, %v475_v12  ;;  %v294_v18 = vadd.f32 %v3298_v19, %v293_v16  ;;  %v295_v20 = vpop.f32.mrb[29].mxu0 }
 0x150   :  { %2605 = vmatpush3.bf16.msra.mxu1 %v2604_v10  ;;  %v733_v20 = vld [vmem:[%s4124_s3 + $0x78] sm:$0xff] }
 0x151   :  { %v476_v23 = vmax.f32 %v294_v18, 0.0  ;;  %v732_v18 = vld [vmem:[%s4124_s3 + $0x70] sm:$0xff]  ;;  %2607 = vmatprep.subr.bf16.mxu1 %v2606_v17 }
 0x152   :  { %v298_v27 = vpop.f32.mrb[30].mxu0  ;;  %v2608_v22 = vpack.c.bf16 %v733_v20, %v732_v18 }
 0x153   :  { %564 = vst.msk [vmem:[#allocation2 + $0x48] sm:$0xff] %vm510_vm0, %v476_v23  ;;  %v299_v29 = vadd.f32 %v3298_v19, %v298_v27  ;;  %v300_v30 = vpop.f32.mrb[31].mxu0 }
 0x154   :  { %2609 = vmatpush3.bf16.msra.mxu1 %v2608_v22 }
 0x155   :  { %v477_v33 = vmax.f32 %v299_v29, 0.0  ;;  %v279_v29 = vadd.f32 %v3298_v19, %v3322_v58 }
 0x156   :  { %v303_v37 = vpop.f32.mrb[32].mxu0 }
 0x157   :  { %v304_v39 = vadd.f32 %v3298_v19, %v303_v37  ;;  %v305_v41 = vpop.f32.mrb[33].mxu0  ;;  %568 = vrot.lane.b32.xlu0 %v477_v33, %s2851_s0  ;;  %v473_v50 = vmax.f32 %v279_v29, 0.0 }
 0x159   :  { %v478_v44 = vmax.f32 %v304_v39, 0.0 }
 0x15a   :  { %v308_v48 = vpop.f32.mrb[34].mxu0 }
 0x15b   :  { %v309_v51 = vadd.f32 %v3298_v19, %v308_v48  ;;  %v310_v52 = vpop.f32.mrb[35].mxu0  ;;  %570 = vrot.lane.b32.xlu0 %v478_v44, %s2851_s0 }
 0x15d   :  { %v479_v55 = vmax.f32 %v309_v51, 0.0 }
 0x15e   :  { %v313_v61 = vpop.f32.mrb[36].mxu0 }
 0x15f   :  { %v314_v63 = vadd.f32 %v3298_v19, %v313_v61  ;;  %v315_v0 = vpop.f32.mrb[37].mxu0  ;;  %572 = vrot.lane.b32.xlu0 %v479_v55, %s2851_s0 }
 0x161   :  { %v480_v5 = vmax.f32 %v314_v63, 0.0 }
 0x162   :  { %v318_v9 = vpop.f32.mrb[38].mxu0 }
 0x163   :  { %v319_v11 = vadd.f32 %v3298_v19, %v318_v9  ;;  %v320_v12 = vpop.f32.mrb[39].mxu0  ;;  %583 = vrot.lane.b32.xlu1 %v480_v5, %s2852_s15 }
 0x165   :  { %v481_v16 = vmax.f32 %v319_v11, 0.0 }
 0x166   :  { %v323_v21 = vpop.f32.mrb[40].mxu0 }
 0x167   :  { %v325_v23 = vpop.f32.mrb[41].mxu0  ;;  %551 = vrot.lane.b32.xlu1 %v472_v15, %s2853_s16  ;;  %585 = vrot.lane.b32.xlu0 %v481_v16, %s2852_s15  ;;  %v324_v30 = vadd.f32 %v3298_v19, %v323_v21 }
 0x169   :  { %v482_v34 = vmax.f32 %v324_v30, 0.0 }
 0x16a   :  { %v328_v25 = vpop.f32.mrb[42].mxu0 }
 0x16b   :  { %v329_v26 = vadd.f32 %v3298_v19, %v328_v25  ;;  %v330_v27 = vpop.f32.mrb[43].mxu0  ;;  %521 = vrot.lane.b32.xlu1 %v467_v40, %s2851_s0 }
 0x16d   :  { %v483_v31 = vmax.f32 %v329_v26, 0.0 }
 0x16e   :  { %v333_v32 = vpop.f32.mrb[44].mxu0 }
 0x16f   :  { %v335_v33 = vpop.f32.mrb[45].mxu0  ;;  %537 = vrot.lane.b32.xlu1 %v470_v28, %s2852_s15  ;;  %598 = vrot.lane.b32.xlu0 %v483_v31, %s2853_s16  ;;  %v334_v35 = vadd.f32 %v3298_v19, %v333_v32  ;;  %v766_v31 = vld [vmem:[%s4124_s3 + $0x180] sm:$0xff]  ;;  %v767_v32 = vld [vmem:[%s4124_s3 + $0x188] sm:$0xff] }
 0x171   :  { %v484_v58 = vmax.f32 %v334_v35, 0.0 }
 0x172   :  { %v338_v36 = vpop.f32.mrb[46].mxu0 }
 0x173   :  { %v340_v37 = vpop.f32.mrb[47].mxu0  ;;  %553 = vrot.lane.b32.xlu1 %v473_v50, %s2853_s16  ;;  %587 = vrot.lane.b32.xlu0 %v482_v34, %s2852_s15  ;;  %v339_v38 = vadd.f32 %v3298_v19, %v338_v36  ;;  %v2610_v36 = vpack.c.bf16 %v767_v32, %v766_v31  ;;  %v750_v32 = vld [vmem:[%s4124_s3 + $0x100] sm:$0xff] }
 0x175   :  { %v485_v43 = vmax.f32 %v339_v38, 0.0  ;;  %2611 = vmatprep.subr.bf16.mxu1 %v2610_v36 }
 0x176   :  { %v343_v39 = vpop.f32.mrb[48].mxu0 }
 0x177   :  { %v344_v41 = vadd.f32 %v3298_v19, %v343_v39  ;;  %v345_v42 = vpop.f32.mrb[49].mxu0  ;;  %600 = vrot.lane.b32.xlu0 %v484_v58, %s2853_s16 }
 0x179   :  { %v486_v44 = vmax.f32 %v344_v41, 0.0 }
 0x17a   :  { %v348_v45 = vpop.f32.mrb[50].mxu0 }
 0x17b   :  { %610 = vst.msk [vmem:[#allocation2 + $0x10] sm:$0xff] %vm510_vm0, %v486_v44  ;;  %v349_v46 = vadd.f32 %v3298_v19, %v348_v45  ;;  %v350_v47 = vpop.f32.mrb[51].mxu0  ;;  %602 = vrot.lane.b32.xlu0 %v485_v43, %s2853_s16 }
 0x17d   :  { %v487_v48 = vmax.f32 %v349_v46, 0.0 }
 0x17e   :  { %v353_v49 = vpop.f32.mrb[52].mxu0 }
 0x17f   :  { %611 = vst.msk [vmem:[#allocation2 + $0x30] sm:$0xff] %vm510_vm0, %v487_v48  ;;  %v354_v51 = vadd.f32 %v3298_v19, %v353_v49  ;;  %v355_v52 = vpop.f32.mrb[53].mxu0 }
 0x181   :  { %v488_v53 = vmax.f32 %v354_v51, 0.0 }
 0x182   :  { %v358_v54 = vpop.f32.mrb[54].mxu0 }
 0x183   :  { %612 = vst.msk [vmem:[#allocation2 + $0x50] sm:$0xff] %vm510_vm0, %v488_v53  ;;  %v359_v55 = vadd.f32 %v3298_v19, %v358_v54  ;;  %v360_v57 = vpop.f32.mrb[55].mxu0 }
 0x185   :  { %v489_v59 = vmax.f32 %v359_v55, 0.0 }
 0x186   :  { %v363_v60 = vpop.f32.mrb[56].mxu0 }
 0x187   :  { %v364_v61 = vadd.f32 %v3298_v19, %v363_v60  ;;  %v365_v62 = vpop.f32.mrb[57].mxu0  ;;  %616 = vrot.lane.b32.xlu1 %v489_v59, %s2851_s0 }
 0x189   :  { %v490_v63 = vmax.f32 %v364_v61, 0.0 }
 0x18a   :  { %v368_v0 = vpop.f32.mrb[58].mxu0 }
 0x18b   :  { %v370_v1 = vpop.f32.mrb[59].mxu0  ;;  %618 = vrot.lane.b32.xlu1 %v490_v63, %s2851_s0  ;;  %v369_v22 = vadd.f32 %v3298_v19, %v368_v0 }
 0x18d   :  { %v491_v25 = vmax.f32 %v369_v22, 0.0 }
 0x18e   :  { %v373_v2 = vpop.f32.mrb[60].mxu0 }
 0x18f   :  { %v374_v4 = vadd.f32 %v3298_v19, %v373_v2  ;;  %v375_v5 = vpop.f32.mrb[61].mxu0 }
 0x191   :  { %v492_v6 = vmax.f32 %v374_v4, 0.0 }
 0x192   :  { %v378_v7 = vpop.f32.mrb[62].mxu0 }
 0x193   :  { %v379_v8 = vadd.f32 %v3298_v19, %v378_v7  ;;  %v380_v9 = vpop.f32.mrb[63].mxu0  ;;  %631 = vrot.lane.b32.xlu1 %v492_v6, %s2852_s15 }
 0x195   :  { %v493_v10 = vmax.f32 %v379_v8, 0.0 }
 0x196   :  { %v383_v11 = vpop.f32.mrb[64].mxu0 }
 0x197   :  { %v385_v12 = vpop.f32.mrb[65].mxu0  ;;  %633 = vrot.lane.b32.xlu1 %v493_v10, %s2852_s15  ;;  %v384_v26 = vadd.f32 %v3298_v19, %v383_v11 }
 0x199   :  { %v518_v56 = vpop.permute.xlu0 %517  ;;  %v494_v33 = vmax.f32 %v384_v26, 0.0 }
 0x19a   :  { %527 = vst.msk [vmem:[#allocation2] sm:$0xff] %vm526_vm1, %v518_v56  ;;  %v388_v13 = vpop.f32.mrb[66].mxu0 }
 0x19b   :  { %v389_v14 = vadd.f32 %v3298_v19, %v388_v13  ;;  %v390_v15 = vpop.f32.mrb[67].mxu0 }
 0x19d   :  { %v495_v16 = vmax.f32 %v389_v14, 0.0  ;;  %v520_v17 = vpop.permute.xlu1 %519 }
 0x19e   :  { %528 = vst.msk [vmem:[#allocation2 + $0x20] sm:$0xff] %vm526_vm1, %v520_v17  ;;  %v393_v18 = vpop.f32.mrb[68].mxu0 }
 0x19f   :  { %v394_v20 = vadd.f32 %v3298_v19, %v393_v18  ;;  %v395_v21 = vpop.f32.mrb[69].mxu0  ;;  %646 = vrot.lane.b32.xlu1 %v495_v16, %s2853_s16 }
 0x1a1   :  { %v496_v23 = vmax.f32 %v394_v20, 0.0 }
 0x1a2   :  { %v398_v40 = vpop.f32.mrb[70].mxu0 }
 0x1a3   :  { %v400_v24 = vpop.f32.mrb[71].mxu0  ;;  %648 = vrot.lane.b32.xlu1 %v496_v23, %s2853_s16  ;;  %v399_v50 = vadd.f32 %v3298_v19, %v398_v40 }
 0x1a5   :  { %v534_v27 = vpop.permute.xlu1 %533  ;;  %v497_v39 = vmax.f32 %v399_v50, 0.0  ;;  %v768_v50 = vld [vmem:[%s4124_s3 + $0x190] sm:$0xff] }
 0x1a6   :  { %543 = vst.msk [vmem:[#allocation2] sm:$0xff] %vm542_vm2, %v534_v27  ;;  %v403_v28 = vpop.f32.mrb[72].mxu0 }
 0x1a7   :  { %v404_v29 = vadd.f32 %v3298_v19, %v403_v28  ;;  %v405_v30 = vpop.f32.mrb[73].mxu0  ;;  %620 = vrot.lane.b32.xlu1 %v491_v25, %s2851_s0 }
 0x1a9   :  { %v498_v34 = vmax.f32 %v404_v29, 0.0  ;;  %v536_v35 = vpop.permute.xlu1 %535 }
 0x1aa   :  { %544 = vst.msk [vmem:[#allocation2 + $0x20] sm:$0xff] %vm542_vm2, %v536_v35  ;;  %v408_v37 = vpop.f32.mrb[74].mxu0 }
 0x1ab   :  { %658 = vst.msk [vmem:[#allocation2 + $0x18] sm:$0xff] %vm510_vm0, %v498_v34  ;;  %v409_v58 = vadd.f32 %v3298_v19, %v408_v37  ;;  %v410_v38 = vpop.f32.mrb[75].mxu0  ;;  %635 = vrot.lane.b32.xlu1 %v494_v33, %s2852_s15  ;;  %v751_v33 = vld [vmem:[%s4124_s3 + $0x108] sm:$0xff]  ;;  %v769_v34 = vld [vmem:[%s4124_s3 + $0x198] sm:$0xff] }
 0x1ac   :  { %v2612_v35 = vpack.c.bf16 %v751_v33, %v750_v32  ;;  %v752_v38 = vld [vmem:[%s4124_s3 + $0x110] sm:$0xff] }
 0x1ad   :  { %v499_v41 = vmax.f32 %v409_v58, 0.0  ;;  %v2614_v58 = vpack.c.bf16 %v769_v34, %v768_v50 }
 0x1ae   :  { %v413_v42 = vpop.f32.mrb[76].mxu0 }
 0x1af   :  { %659 = vst.msk [vmem:[#allocation2 + $0x38] sm:$0xff] %vm510_vm0, %v499_v41  ;;  %v414_v43 = vadd.f32 %v3298_v19, %v413_v42  ;;  %v415_v44 = vpop.f32.mrb[77].mxu0  ;;  %650 = vrot.lane.b32.xlu1 %v497_v39, %s2853_s16  ;;  %v753_v39 = vld [vmem:[%s4124_s3 + $0x118] sm:$0xff]  ;;  %v770_v42 = vld [vmem:[%s4124_s3 + $0x1a0] sm:$0xff] }
 0x1b0   :  { %v2616_v44 = vpack.c.bf16 %v753_v39, %v752_v38 }
 0x1b1   :  { %v500_v45 = vmax.f32 %v414_v43, 0.0  ;;  %v550_v46 = vpop.permute.xlu1 %549  ;;  %v771_v43 = vld [vmem:[%s4124_s3 + $0x1a8] sm:$0xff] }
 0x1b2   :  { %559 = vst.msk [vmem:[#allocation2] sm:$0xff] %vm558_vm3, %v550_v46  ;;  %v418_v47 = vpop.f32.mrb[78].mxu0  ;;  %v2618_v46 = vpack.c.bf16 %v771_v43, %v770_v42 }
 0x1b3   :  { %660 = vst.msk [vmem:[#allocation2 + $0x58] sm:$0xff] %vm510_vm0, %v500_v45  ;;  %v419_v48 = vadd.f32 %v3298_v19, %v418_v47  ;;  %v420_v49 = vpop.f32.mrb[79].mxu0  ;;  %v754_v47 = vld [vmem:[%s4124_s3 + $0x120] sm:$0xff] }
 0x1b4   :  { %v772_v49 = vld [vmem:[%s4124_s3 + $0x1b0] sm:$0xff] }
 0x1b5   :  { %v501_v51 = vmax.f32 %v419_v48, 0.0  ;;  %v755_v48 = vld [vmem:[%s4124_s3 + $0x128] sm:$0xff] }
 0x1b6   :  { %v423_v52 = vpop.f32.mrb[80].mxu0 }
 0x1b7   :  { %v424_v53 = vadd.f32 %v3298_v19, %v423_v52  ;;  %v425_v54 = vpop.f32.mrb[81].mxu0  ;;  %664 = vrot.lane.b32.xlu0 %v501_v51, %s2851_s0  ;;  %v773_v51 = vld [vmem:[%s4124_s3 + $0x1b8] sm:$0xff]  ;;  %v2620_v52 = vpack.c.bf16 %v755_v48, %v754_v47  ;;  %v1020_v47 = vld [vmem:[%s4124_s3 + $0x200] sm:$0xff] }
 0x1b8   :  { %v2622_v54 = vpack.c.bf16 %v773_v51, %v772_v49  ;;  %v1021_v49 = vld [vmem:[%s4124_s3 + $0x208] sm:$0xff]  ;;  %v1038_v51 = vld [vmem:[%s4124_s3 + $0x290] sm:$0xff] }
 0x1b9   :  { %v502_v55 = vmax.f32 %v424_v53, 0.0  ;;  %v706_v41 = vld [vmem:[#allocation2] sm:$0xff] }
 0x1ba   :  { %v428_v57 = vpop.f32.mrb[82].mxu0 }
 0x1bb   :  { %v430_v59 = vpop.f32.mrb[83].mxu0  ;;  %666 = vrot.lane.b32.xlu0 %v502_v55, %s2851_s0  ;;  %v429_v15 = vadd.f32 %v3298_v19, %v428_v57  ;;  %v756_v55 = vld [vmem:[%s4124_s3 + $0x130] sm:$0xff]  ;;  %v757_v57 = vld [vmem:[%s4124_s3 + $0x138] sm:$0xff] }
 0x1bd   :  { %v503_v21 = vmax.f32 %v429_v15, 0.0 }
 0x1be   :  { %v433_v60 = vpop.f32.mrb[84].mxu0 }
 0x1bf   :  { %v434_v61 = vadd.f32 %v3298_v19, %v433_v60  ;;  %v435_v62 = vpop.f32.mrb[85].mxu0  ;;  %v774_v60 = vld [vmem:[%s4124_s3 + $0x1c0] sm:$0xff] }
 0x1c0   :  { %v2624_v62 = vpack.c.bf16 %v757_v57, %v756_v55  ;;  %v1022_v55 = vld [vmem:[%s4124_s3 + $0x210] sm:$0xff]  ;;  %v1023_v57 = vld [vmem:[%s4124_s3 + $0x218] sm:$0xff] }
 0x1c1   :  { %v504_v63 = vmax.f32 %v434_v61, 0.0  ;;  %v775_v61 = vld [vmem:[%s4124_s3 + $0x1c8] sm:$0xff] }
 0x1c2   :  { %v438_v0 = vpop.f32.mrb[86].mxu0 }
 0x1c3   :  { %v439_v1 = vadd.f32 %v3298_v19, %v438_v0  ;;  %v440_v2 = vpop.f32.mrb[87].mxu0  ;;  %679 = vrot.lane.b32.xlu0 %v504_v63, %s2852_s15  ;;  %v2626_v0 = vpack.c.bf16 %v775_v61, %v774_v60  ;;  %v1041_v60 = vld [vmem:[%s4124_s3 + $0x2a8] sm:$0xff]  ;;  %v2648_v61 = vpack.c.bf16 %v1023_v57, %v1022_v55 }
 0x1c4   :  { %v759_v2 = vld [vmem:[%s4124_s3 + $0x148] sm:$0xff] }
 0x1c5   :  { %v505_v4 = vmax.f32 %v439_v1, 0.0  ;;  %v758_v1 = vld [vmem:[%s4124_s3 + $0x140] sm:$0xff] }
 0x1c6   :  { %v443_v5 = vpop.f32.mrb[88].mxu0 }
 0x1c7   :  { %v445_v6 = vpop.f32.mrb[89].mxu0  ;;  %681 = vrot.lane.b32.xlu0 %v505_v4, %s2852_s15  ;;  %v444_v22 = vadd.f32 %v3298_v19, %v443_v5  ;;  %v776_v5 = vld [vmem:[%s4124_s3 + $0x1d0] sm:$0xff] }
 0x1c8   :  { %v777_v6 = vld [vmem:[%s4124_s3 + $0x1d8] sm:$0xff] }
 0x1c9   :  { %v569_v7 = vpop.permute.xlu0 %568  ;;  %v506_v24 = vmax.f32 %v444_v22, 0.0 }
 0x1ca   :  { %577 = vst.msk [vmem:[#allocation2 + $0x8] sm:$0xff] %vm526_vm1, %v569_v7  ;;  %v448_v8 = vpop.f32.mrb[90].mxu0  ;;  %v2628_v7 = vpack.c.bf16 %v759_v2, %v758_v1  ;;  %v1042_v1 = vld [vmem:[%s4124_s3 + $0x2b0] sm:$0xff]  ;;  %v1043_v2 = vld [vmem:[%s4124_s3 + $0x2b8] sm:$0xff] }
 0x1cb   :  { %v449_v9 = vadd.f32 %v3298_v19, %v448_v8  ;;  %v450_v10 = vpop.f32.mrb[91].mxu0 }
 0x1cc   :  { %v760_v10 = vld [vmem:[%s4124_s3 + $0x150] sm:$0xff] }
 0x1cd   :  { %v507_v11 = vmax.f32 %v449_v9, 0.0  ;;  %v571_v12 = vpop.permute.xlu0 %570  ;;  %v2630_v9 = vpack.c.bf16 %v777_v6, %v776_v5 }
 0x1ce   :  { %578 = vst.msk [vmem:[#allocation2 + $0x28] sm:$0xff] %vm526_vm1, %v571_v12  ;;  %v453_v56 = vpop.f32.mrb[92].mxu0  ;;  %v778_v12 = vld [vmem:[%s4124_s3 + $0x1e0] sm:$0xff] }
 0x1cf   :  { %v454_v13 = vadd.f32 %v3298_v19, %v453_v56  ;;  %v455_v14 = vpop.f32.mrb[93].mxu0  ;;  %694 = vrot.lane.b32.xlu0 %v507_v11, %s2853_s16  ;;  %v761_v11 = vld [vmem:[%s4124_s3 + $0x158] sm:$0xff]  ;;  %v779_v56 = vld [vmem:[%s4124_s3 + $0x1e8] sm:$0xff] }
 0x1d0   :  { %v2634_v15 = vpack.c.bf16 %v779_v56, %v778_v12 }
 0x1d1   :  { %v508_v16 = vmax.f32 %v454_v13, 0.0  ;;  %v573_v17 = vpop.permute.xlu0 %572  ;;  %v2632_v13 = vpack.c.bf16 %v761_v11, %v760_v10 }
 0x1d2   :  { %579 = vst.msk [vmem:[#allocation2 + $0x48] sm:$0xff] %vm526_vm1, %v573_v17  ;;  %v458_v18 = vpop.f32.mrb[94].mxu0  ;;  %v763_v17 = vld [vmem:[%s4124_s3 + $0x168] sm:$0xff] }
 0x1d3   :  { %696 = vrot.lane.b32.xlu0 %v508_v16, %s2853_s16  ;;  %v460_v20 = vpop.f32.mrb[95].mxu0  ;;  %v459_v40 = vadd.f32 %v3298_v19, %v458_v18  ;;  %v762_v16 = vld [vmem:[%s4124_s3 + $0x160] sm:$0xff]  ;;  %v780_v18 = vld [vmem:[%s4124_s3 + $0x1f0] sm:$0xff] }
 0x1d4   :  { %v781_v20 = vld [vmem:[%s4124_s3 + $0x1f8] sm:$0xff] }
 0x1d5   :  { %v584_v23 = vpop.permute.xlu1 %583  ;;  %v509_v27 = vmax.f32 %v459_v40, 0.0  ;;  %v2638_v22 = vpack.c.bf16 %v781_v20, %v780_v18  ;;  %v765_v40 = vld [vmem:[%s4124_s3 + $0x178] sm:$0xff] }
 0x1d6   :  { %592 = vst.msk [vmem:[#allocation2 + $0x8] sm:$0xff] %vm542_vm2, %v584_v23  ;;  %v764_v23 = vld [vmem:[%s4124_s3 + $0x170] sm:$0xff] }
 0x1d7   :  { %668 = vrot.lane.b32.xlu0 %v503_v21, %s2851_s0  ;;  %v2636_v21 = vpack.c.bf16 %v763_v17, %v762_v16  ;;  %v2156_v17 = vld [vmem:[%s4124_s3 + $0x4c0] ss:$0 sm:$0xff] }
 0x1d9   :  { %v552_v25 = vpop.permute.xlu1 %551  ;;  %v586_v26 = vpop.permute.xlu0 %585 }
 0x1da   :  { %560 = vst.msk [vmem:[#allocation2 + $0x20] sm:$0xff] %vm558_vm3, %v552_v25 }
 0x1db   :  { %593 = vst.msk [vmem:[#allocation2 + $0x28] sm:$0xff] %vm542_vm2, %v586_v26  ;;  %683 = vrot.lane.b32.xlu0 %v506_v24, %s2852_s15  ;;  %v2640_v24 = vpack.c.bf16 %v765_v40, %v764_v23  ;;  %v1044_v23 = vld [vmem:[%s4124_s3 + $0x2c0] sm:$0xff]  ;;  %v1045_v40 = vld [vmem:[%s4124_s3 + $0x2c8] sm:$0xff] }
 0x1dd   :  { %v522_v28 = vpop.permute.xlu1 %521 }
 0x1de   :  { %529 = vst.msk [vmem:[#allocation2 + $0x40] sm:$0xff] %vm526_vm1, %v522_v28 }
 0x1df   :  { %698 = vrot.lane.b32.xlu0 %v509_v27, %s2853_s16 }
 0x1e1   :  { %v538_v29 = vpop.permute.xlu1 %537  ;;  %v599_v30 = vpop.permute.xlu0 %598  ;;  %v710_v59 = vld [vmem:[#allocation2 + $0x20] sm:$0xff] }
 0x1e2   :  { %545 = vst.msk [vmem:[#allocation2 + $0x40] sm:$0xff] %vm542_vm2, %v538_v29 }
 0x1e3   :  { %607 = vst.msk [vmem:[#allocation2 + $0x8] sm:$0xff] %vm558_vm3, %v599_v30 }
 0x1e5   :  { %v554_v19 = vpop.permute.xlu1 %553  ;;  %v588_v31 = vpop.permute.xlu0 %587 }
 0x1e6   :  { %561 = vst.msk [vmem:[#allocation2 + $0x40] sm:$0xff] %vm558_vm3, %v554_v19 }
 0x1e7   :  { %594 = vst.msk [vmem:[#allocation2 + $0x48] sm:$0xff] %vm542_vm2, %v588_v31 }
 0x1e9   :  { %v601_v36 = vpop.permute.xlu0 %600 }
 0x1ea   :  { %v707_v37 = vld [vmem:[#allocation2 + $0x8] sm:$0xff]  ;;  %608 = vst.msk [vmem:[#allocation2 + $0x28] sm:$0xff] %vm558_vm3, %v601_v36 }
 0x1eb   :  { %851 = vmatprep.mubr.f32.mxu1 %v707_v37 }
 0x1ec   :  { %852 = vmatmul.mubr.f32.vlgmr.msra.gmra.mrb[0].mxu1 %v706_v41 }
 0x1ed   :  { %2613 = vmatpush3.bf16.msra.mxu1 %v2612_v35  ;;  %v603_v45 = vpop.permute.xlu0 %602  ;;  %v714_v4 = vld [vmem:[#allocation2 + $0x40] sm:$0xff] }
 0x1ee   :  { %2615 = vmatprep.subr.bf16.mxu1 %v2614_v58  ;;  %609 = vst.msk [vmem:[#allocation2 + $0x48] sm:$0xff] %vm558_vm3, %v603_v45  ;;  %v1036_v45 = vld [vmem:[%s4124_s3 + $0x280] sm:$0xff] }
 0x1f1   :  { %2617 = vmatpush3.bf16.msra.mxu1 %v2616_v44  ;;  %v711_v53 = vld [vmem:[#allocation2 + $0x28] sm:$0xff] }
 0x1f2   :  { %2619 = vmatprep.subr.bf16.mxu1 %v2618_v46  ;;  %856 = vmatprep.mubr.f32.mxu1 %v711_v53  ;;  %v1037_v46 = vld [vmem:[%s4124_s3 + $0x288] sm:$0xff]  ;;  %v2644_v53 = vpack.c.bf16 %v1021_v49, %v1020_v47  ;;  %v1034_v49 = vld [vmem:[%s4124_s3 + $0x270] sm:$0xff] }
 0x1f3   :  { %857 = vmatmul.mubr.f32.gmra.mrb[2].mxu1 %v710_v59  ;;  %v2642_v48 = vpack.c.bf16 %v1037_v46, %v1036_v45  ;;  %v1040_v59 = vld [vmem:[%s4124_s3 + $0x2a0] sm:$0xff]  ;;  %v1051_v45 = vld [vmem:[%s4124_s3 + $0x2f8] sm:$0xff] }
 0x1f5   :  { %2621 = vmatpush3.bf16.msra.mxu1 %v2620_v52  ;;  %v715_v63 = vld [vmem:[#allocation2 + $0x48] sm:$0xff]  ;;  %v1039_v52 = vld [vmem:[%s4124_s3 + $0x298] sm:$0xff] }
 0x1f6   :  { %2623 = vmatprep.subr.bf16.mxu1 %v2622_v54  ;;  %861 = vmatprep.mubr.f32.mxu1 %v715_v63  ;;  %v2646_v54 = vpack.c.bf16 %v1039_v52, %v1038_v51  ;;  %v1024_v63 = vld [vmem:[%s4124_s3 + $0x220] sm:$0xff]  ;;  %v1035_v51 = vld [vmem:[%s4124_s3 + $0x278] sm:$0xff] }
 0x1f7   :  { %862 = vmatmul.mubr.f32.gmra.mrb[4].mxu1 %v714_v4  ;;  %v2672_v52 = vpack.c.bf16 %v1035_v51, %v1034_v49  ;;  %v1061_v49 = vld [vmem:[%s4124_s3 + $0x348] sm:$0xff]  ;;  %v1078_v51 = vld [vmem:[%s4124_s3 + $0x3d0] sm:$0xff] }
 0x1f9   :  { %2625 = vmatpush3.bf16.msra.mxu1 %v2624_v62  ;;  %v617_v8 = vpop.permute.xlu1 %616  ;;  %v2650_v62 = vpack.c.bf16 %v1041_v60, %v1040_v59 }
 0x1fa   :  { %2627 = vmatprep.subr.bf16.mxu1 %v2626_v0  ;;  %625 = vst.msk [vmem:[#allocation2 + $0x10] sm:$0xff] %vm526_vm1, %v617_v8  ;;  %v1025_v0 = vld [vmem:[%s4124_s3 + $0x228] sm:$0xff]  ;;  %v1026_v8 = vld [vmem:[%s4124_s3 + $0x230] sm:$0xff] }
 0x1fb   :  { %v2652_v5 = vpack.c.bf16 %v1025_v0, %v1024_v63  ;;  %v1068_v63 = vld [vmem:[%s4124_s3 + $0x380] sm:$0xff]  ;;  %v1069_v0 = vld [vmem:[%s4124_s3 + $0x388] sm:$0xff] }
 0x1fd   :  { %2629 = vmatpush3.bf16.msra.mxu1 %v2628_v7  ;;  %v619_v14 = vpop.permute.xlu1 %618  ;;  %v2654_v7 = vpack.c.bf16 %v1043_v2, %v1042_v1 }
 0x1fe   :  { %2631 = vmatprep.subr.bf16.mxu1 %v2630_v9  ;;  %626 = vst.msk [vmem:[#allocation2 + $0x30] sm:$0xff] %vm526_vm1, %v619_v14  ;;  %v1027_v9 = vld [vmem:[%s4124_s3 + $0x238] sm:$0xff] }
 0x1ff   :  { %v2656_v11 = vpack.c.bf16 %v1027_v9, %v1026_v8 }
 0x201   :  { %2633 = vmatpush3.bf16.msra.mxu1 %v2632_v13 }
 0x202   :  { %2635 = vmatprep.subr.bf16.mxu1 %v2634_v15 }
 0x205   :  { %2637 = vmatpush3.bf16.msra.mxu1 %v2636_v21  ;;  %v632_v25 = vpop.permute.xlu1 %631 }
 0x206   :  { %2639 = vmatprep.subr.bf16.mxu1 %v2638_v22  ;;  %640 = vst.msk [vmem:[#allocation2 + $0x10] sm:$0xff] %vm542_vm2, %v632_v25  ;;  %v1028_v25 = vld [vmem:[%s4124_s3 + $0x240] sm:$0xff] }
 0x209   :  { %2641 = vmatpush3.bf16.msra.mxu1 %v2640_v24  ;;  %v634_v26 = vpop.permute.xlu1 %633  ;;  %v2658_v24 = vpack.c.bf16 %v1045_v40, %v1044_v23  ;;  %v1053_v23 = vld [vmem:[%s4124_s3 + $0x308] sm:$0xff] }
 0x20a   :  { %641 = vst.msk [vmem:[#allocation2 + $0x30] sm:$0xff] %vm542_vm2, %v634_v26  ;;  %2643 = vmatprep.subr.bf16.mxu1 %v2642_v48  ;;  %v1029_v26 = vld [vmem:[%s4124_s3 + $0x248] sm:$0xff] }
 0x211   :  { %v647_v27 = vpop.permute.xlu1 %646 }
 0x212   :  { %655 = vst.msk [vmem:[#allocation2 + $0x10] sm:$0xff] %vm558_vm3, %v647_v27 }
 0x215   :  { %v649_v28 = vpop.permute.xlu1 %648 }
 0x216   :  { %656 = vst.msk [vmem:[#allocation2 + $0x30] sm:$0xff] %vm558_vm3, %v649_v28 }
 0x219   :  { %v621_v29 = vpop.permute.xlu1 %620  ;;  %v708_v58 = vld [vmem:[#allocation2 + $0x10] sm:$0xff] }
 0x21a   :  { %627 = vst.msk [vmem:[#allocation2 + $0x50] sm:$0xff] %vm526_vm1, %v621_v29  ;;  %v2660_v29 = vpack.c.bf16 %v1029_v26, %v1028_v25  ;;  %v1070_v25 = vld [vmem:[%s4124_s3 + $0x390] sm:$0xff]  ;;  %v1071_v26 = vld [vmem:[%s4124_s3 + $0x398] sm:$0xff] }
 0x21d   :  { %v636_v30 = vpop.permute.xlu1 %635  ;;  %v712_v41 = vld [vmem:[#allocation2 + $0x30] sm:$0xff] }
 0x21e   :  { %642 = vst.msk [vmem:[#allocation2 + $0x50] sm:$0xff] %vm542_vm2, %v636_v30 }
 0x221   :  { %v651_v19 = vpop.permute.xlu1 %650 }
 0x222   :  { %657 = vst.msk [vmem:[#allocation2 + $0x50] sm:$0xff] %vm558_vm3, %v651_v19 }
 0x229   :  { %v665_v31 = vpop.permute.xlu0 %664  ;;  %v716_v44 = vld [vmem:[#allocation2 + $0x50] sm:$0xff] }
 0x22a   :  { %673 = vst.msk [vmem:[#allocation2 + $0x18] sm:$0xff] %vm526_vm1, %v665_v31 }
 0x22d   :  { %v667_v32 = vpop.permute.xlu0 %666 }
 0x22e   :  { %674 = vst.msk [vmem:[#allocation2 + $0x38] sm:$0xff] %vm526_vm1, %v667_v32 }
 0x235   :  { %v680_v33 = vpop.permute.xlu0 %679 }
 0x236   :  { %688 = vst.msk [vmem:[#allocation2 + $0x18] sm:$0xff] %vm542_vm2, %v680_v33  ;;  %v1046_v33 = vld [vmem:[%s4124_s3 + $0x2d0] sm:$0xff] }
 0x239   :  { %v682_v50 = vpop.permute.xlu0 %681 }
 0x23a   :  { %689 = vst.msk [vmem:[#allocation2 + $0x38] sm:$0xff] %vm542_vm2, %v682_v50  ;;  %v1047_v50 = vld [vmem:[%s4124_s3 + $0x2d8] sm:$0xff] }
 0x241   :  { %v695_v34 = vpop.permute.xlu0 %694 }
 0x242   :  { %703 = vst.msk [vmem:[#allocation2 + $0x18] sm:$0xff] %vm558_vm3, %v695_v34  ;;  %v2662_v34 = vpack.c.bf16 %v1047_v50, %v1046_v33  ;;  %v1072_v33 = vld [vmem:[%s4124_s3 + $0x3a0] sm:$0xff]  ;;  %v1073_v50 = vld [vmem:[%s4124_s3 + $0x3a8] sm:$0xff] }
 0x245   :  { %v697_v35 = vpop.permute.xlu0 %696 }
 0x246   :  { %704 = vst.msk [vmem:[#allocation2 + $0x38] sm:$0xff] %vm558_vm3, %v697_v35  ;;  %v1030_v35 = vld [vmem:[%s4124_s3 + $0x250] sm:$0xff] }
 0x249   :  { %v669_v36 = vpop.permute.xlu0 %668  ;;  %v709_v37 = vld [vmem:[#allocation2 + $0x18] sm:$0xff] }
 0x24a   :  { %675 = vst.msk [vmem:[#allocation2 + $0x58] sm:$0xff] %vm526_vm1, %v669_v36  ;;  %931 = vmatprep.mubr.f32.mxu1 %v709_v37  ;;  %v1031_v36 = vld [vmem:[%s4124_s3 + $0x258] sm:$0xff]  ;;  %vm1816_vm1 = vcmask 1041408  }
 0x24b   :  { %932 = vmatmul.mubr.f32.vlgmr.msra.gmra.mrb[6].mxu1 %v708_v58  ;;  %v2664_v58 = vpack.c.bf16 %v1031_v36, %v1030_v35  ;;  %v2682_v35 = vpack.c.bf16 %v1073_v50, %v1072_v33  ;;  %v1056_v36 = vld [vmem:[%s4124_s3 + $0x320] sm:$0xff]  ;;  %v1355_v33 = vld [vmem:[%s4124_s3 + $0x478] sm:$0xff] }
 0x24c   :  { %2645 = vmatpush3.bf16.msra.mxu1 %v2644_v53 }
 0x24d   :  { %v684_v38 = vpop.permute.xlu0 %683  ;;  %v713_v39 = vld [vmem:[#allocation2 + $0x38] sm:$0xff]  ;;  %2647 = vmatprep.subr.bf16.mxu1 %v2646_v54 }
 0x24e   :  { %690 = vst.msk [vmem:[#allocation2 + $0x58] sm:$0xff] %vm542_vm2, %v684_v38  ;;  %936 = vmatprep.mubr.f32.mxu1 %v713_v39  ;;  %v1048_v38 = vld [vmem:[%s4124_s3 + $0x2e0] sm:$0xff]  ;;  %v1049_v39 = vld [vmem:[%s4124_s3 + $0x2e8] sm:$0xff] }
 0x24f   :  { %937 = vmatmul.mubr.f32.gmra.mrb[8].mxu1 %v712_v41  ;;  %v1032_v41 = vld [vmem:[%s4124_s3 + $0x260] sm:$0xff] }
 0x250   :  { %2649 = vmatpush3.bf16.msra.mxu1 %v2648_v61 }
 0x251   :  { %v699_v42 = vpop.permute.xlu0 %698  ;;  %2651 = vmatprep.subr.bf16.mxu1 %v2650_v62 }
 0x252   :  { %705 = vst.msk [vmem:[#allocation2 + $0x58] sm:$0xff] %vm558_vm3, %v699_v42  ;;  %v2666_v42 = vpack.c.bf16 %v1049_v39, %v1048_v38  ;;  %v1075_v38 = vld [vmem:[%s4124_s3 + $0x3b8] sm:$0xff] }
 0x254   :  { %2653 = vmatpush3.bf16.msra.mxu1 %v2652_v5 }
 0x255   :  { %2655 = vmatprep.subr.bf16.mxu1 %v2654_v7 }
 0x258   :  { %2657 = vmatpush3.bf16.msra.mxu1 %v2656_v11 }
 0x259   :  { %v717_v43 = vld [vmem:[#allocation2 + $0x58] sm:$0xff]  ;;  %2659 = vmatprep.subr.bf16.mxu1 %v2658_v24 }
 0x25a   :  { %941 = vmatprep.mubr.f32.mxu1 %v717_v43  ;;  %v1033_v43 = vld [vmem:[%s4124_s3 + $0x268] sm:$0xff] }
 0x25b   :  { %942 = vmatmul.mubr.f32.gmra.mrb[10].mxu1 %v716_v44  ;;  %v1050_v44 = vld [vmem:[%s4124_s3 + $0x2f0] sm:$0xff]  ;;  %v2668_v47 = vpack.c.bf16 %v1033_v43, %v1032_v41  ;;  %v1059_v43 = vld [vmem:[%s4124_s3 + $0x338] sm:$0xff] }
 0x25c   :  { %2661 = vmatpush3.bf16.msra.mxu1 %v2660_v29  ;;  %v2670_v48 = vpack.c.bf16 %v1051_v45, %v1050_v44  ;;  %v1076_v44 = vld [vmem:[%s4124_s3 + $0x3c0] sm:$0xff]  ;;  %v1077_v45 = vld [vmem:[%s4124_s3 + $0x3c8] sm:$0xff] }
 0x25d   :  { %2663 = vmatprep.subr.bf16.mxu1 %v2662_v34 }
 0x260   :  { %2665 = vmatpush3.bf16.msra.mxu1 %v2664_v58  ;;  %v1074_v58 = vld [vmem:[%s4124_s3 + $0x3b0] sm:$0xff] }
 0x261   :  { %2667 = vmatprep.subr.bf16.mxu1 %v2666_v42  ;;  %v2686_v41 = vpack.c.bf16 %v1075_v38, %v1074_v58  ;;  %v1058_v42 = vld [vmem:[%s4124_s3 + $0x330] sm:$0xff]  ;;  %v1359_v58 = vld [vmem:[%s4124_s3 + $0x498] sm:$0xff] }
 0x264   :  { %2669 = vmatpush3.bf16.msra.mxu1 %v2668_v47  ;;  %v2690_v47 = vpack.c.bf16 %v1077_v45, %v1076_v44  ;;  %v1363_v44 = vld [vmem:[%s4124_s3 + $0x4b8] sm:$0xff] }
 0x265   :  { %2671 = vmatprep.subr.bf16.mxu1 %v2670_v48  ;;  %v1060_v48 = vld [vmem:[%s4124_s3 + $0x340] sm:$0xff] }
 0x268   :  { %2673 = vmatpush3.bf16.msra.mxu1 %v2672_v52  ;;  %v1079_v52 = vld [vmem:[%s4124_s3 + $0x3d8] sm:$0xff] }
 0x2bf   :  { %v2222_v4 = vpop.f32.mrb[0].mxu1 }
 0x2c0   :  { %v2223_v6 = vpop.f32.mrb[1].mxu1 }
 0x2c1   :  { %v2224_v10 = vadd.f32 %v2223_v6, %v2222_v4  ;;  %v2674_v4 = vpack.c.bf16 %v1069_v0, %v1068_v63  ;;  %v1064_v63 = vld [vmem:[%s4124_s3 + $0x360] sm:$0xff]  ;;  %v1065_v0 = vld [vmem:[%s4124_s3 + $0x368] sm:$0xff] }
 0x2c3   :  { %v854_v21 = vadd.f32 %v2224_v10, %v2156_v17  ;;  %2675 = vmatprep.subr.bf16.mxu1 %v2674_v4  ;;  %v1341_v10 = vld [vmem:[%s4123_s2] sm:$0x3]  ;;  %v2700_v4 = vpack.c.bf16 %v1065_v0, %v1064_v63 }
 0x2c6   :  { %v2225_v12 = vpop.f32.mrb[2].mxu1 }
 0x2c7   :  { %v2226_v56 = vpop.f32.mrb[3].mxu1 }
 0x2c8   :  { %v2227_v13 = vadd.f32 %v2226_v56, %v2225_v12  ;;  %v2854_v56 = vmov 1983009808  }
 0x2ca   :  { %v2228_v14 = vpop.f32.mrb[4].mxu1  ;;  %v859_v19 = vadd.f32 %v2227_v13, %v2156_v17  ;;  %v1101_v13 = vunpack.c.l.s4 %v2854_v56  ;;  %v1087_v56 = vld [vmem:[%s4124_s3 + $0x418] sm:$0xff] }
 0x2cb   :  { %v2229_v15 = vpop.f32.mrb[5].mxu1 }
 0x2cc   :  { %v2230_v16 = vadd.f32 %v2229_v15, %v2228_v14  ;;  %v1103_v14 = vlaneseq }
 0x2ce   :  { %v864_v61 = vadd.f32 %v2230_v16, %v2156_v17  ;;  %v1102_v17 = vunpack.c.0.s8 %v1101_v13 }
 0x31e   :  { %v2263_v18 = vpop.f32.mrb[6].mxu1 }
 0x31f   :  { %v2264_v20 = vpop.f32.mrb[7].mxu1 }
 0x320   :  { %v2265_v22 = vadd.f32 %v2264_v20, %v2263_v18  ;;  %v3762_v18 = vshrl.u32 %v1103_v14, 7 }
 0x322   :  { %v934_v27 = vadd.f32 %v2265_v22, %v854_v21  ;;  %v2266_v28 = vpop.f32.mrb[8].mxu1  ;;  %v1105_v20 = vsub.s32 %v1102_v17, %v3762_v18  ;;  %v1052_v22 = vld [vmem:[%s4124_s3 + $0x300] sm:$0xff]  ;;  %v1089_v17 = vld [vmem:[%s4124_s3 + $0x428] sm:$0xff] }
 0x323   :  { %v2267_v30 = vpop.f32.mrb[9].mxu1 }
 0x324   :  { %v947_v31 = vmax.f32 %v934_v27, 0.0  ;;  %v2268_v32 = vadd.f32 %v2267_v30, %v2266_v28  ;;  %v2676_v28 = vpack.c.bf16 %v1053_v23, %v1052_v22  ;;  %v2678_v30 = vpack.c.bf16 %v1071_v26, %v1070_v25  ;;  %v1091_v22 = vld [vmem:[%s4124_s3 + $0x438] sm:$0xff]  ;;  %v1349_v25 = vld [vmem:[%s4124_s3 + $0x448] sm:$0xff] }
 0x326   :  { %951 = vst.msk [vmem:[#allocation3] sm:$0xff] %vm950_vm4, %v947_v31  ;;  %v939_v37 = vadd.f32 %v2268_v32, %v859_v19  ;;  %v1054_v19 = vld [vmem:[%s4124_s3 + $0x310] sm:$0xff]  ;;  %v1055_v31 = vld [vmem:[%s4124_s3 + $0x318] sm:$0xff] }
 0x327   :  { %v2680_v34 = vpack.c.bf16 %v1055_v31, %v1054_v19  ;;  %v1353_v19 = vld [vmem:[%s4124_s3 + $0x468] sm:$0xff] }
 0x328   :  { %v948_v46 = vmax.f32 %v939_v37, 0.0  ;;  %v1057_v37 = vld [vmem:[%s4124_s3 + $0x328] sm:$0xff] }
 0x329   :  { %v2684_v39 = vpack.c.bf16 %v1057_v37, %v1056_v36  ;;  %v1358_v37 = vld [vmem:[%s4124_s3 + $0x490] sm:$0xff] }
 0x32a   :  { %952 = vst.msk [vmem:[#allocation3 + $0x8] sm:$0xff] %vm950_vm4, %v948_v46  ;;  %v2688_v46 = vpack.c.bf16 %v1059_v43, %v1058_v42  ;;  %v2734_v38 = vpack.c.bf16 %v1359_v58, %v1358_v37  ;;  %v1362_v43 = vld [vmem:[%s4124_s3 + $0x4b0] sm:$0xff] }
 0x32b   :  { %v2740_v45 = vpack.c.bf16 %v1363_v44, %v1362_v43 }
 0x32d   :  { %v2158_v53 = vld.sshfl [vmem:[#allocation3 + $0x6] sm:$0x3 pattern:$0x76325410]  ;;  %v971_v54 = vld [vmem:[#allocation3 + $0x4] sm:$0x3] }
 0x32e   :  { %v2269_v55 = vpop.f32.mrb[10].mxu1  ;;  %982 = vrot.lane.b32.xlu1 %v2158_v53, %s2852_s15  ;;  %v2157_v57 = vld.sshfl [vmem:[#allocation3 + $0x2] sm:$0x3 pattern:$0x76325410]  ;;  %v2692_v53 = vpack.c.bf16 %v1061_v49, %v1060_v48 }
 0x32f   :  { %972 = vst.msk [vmem:[#allocation4 + $0x2] sm:$0x3] %vm955_vm5, %v971_v54  ;;  %966 = vrot.lane.b32.xlu0 %v2157_v57, %s2852_s15  ;;  %v2270_v59 = vpop.f32.mrb[11].mxu1  ;;  %v954_v60 = vld [vmem:[#allocation3] sm:$0x3]  ;;  %v2694_v54 = vpack.c.bf16 %v1079_v52, %v1078_v51  ;;  %v1063_v57 = vld [vmem:[%s4124_s3 + $0x358] sm:$0xff] }
 0x330   :  { %v2271_v62 = vadd.f32 %v2270_v59, %v2269_v55  ;;  %956 = vst.msk [vmem:[#allocation4] sm:$0x3] %vm955_vm5, %v954_v60  ;;  %v1062_v55 = vld [vmem:[%s4124_s3 + $0x350] sm:$0xff]  ;;  %v1080_v59 = vld [vmem:[%s4124_s3 + $0x3e0] sm:$0xff]  ;;  %v1081_v60 = vld [vmem:[%s4124_s3 + $0x3e8] sm:$0xff] }
 0x331   :  { %v2160_v1 = vld.sshfl [vmem:[#allocation3 + $0xe] sm:$0x3 pattern:$0x76325410]  ;;  %v1001_v2 = vld [vmem:[#allocation3 + $0xc] sm:$0x3] }
 0x332   :  { %v944_v5 = vadd.f32 %v2271_v62, %v864_v61  ;;  %1012 = vrot.lane.b32.xlu1 %v2160_v1, %s2852_s15  ;;  %v2159_v6 = vld.sshfl [vmem:[#allocation3 + $0xa] sm:$0x3 pattern:$0x76325410]  ;;  %1002 = vst.msk [vmem:[#allocation4 + $0x6] sm:$0x3] %vm955_vm5, %v1001_v2  ;;  %v2696_v61 = vpack.c.bf16 %v1063_v57, %v1062_v55  ;;  %v2698_v62 = vpack.c.bf16 %v1081_v60, %v1080_v59 }
 0x333   :  { %v986_v7 = vld [vmem:[#allocation3 + $0x8] sm:$0x3]  ;;  %997 = vrot.lane.b32.xlu0 %v2159_v6, %s2852_s15  ;;  %v1082_v1 = vld [vmem:[%s4124_s3 + $0x3f0] sm:$0xff]  ;;  %v1083_v2 = vld [vmem:[%s4124_s3 + $0x3f8] sm:$0xff] }
 0x334   :  { %987 = vst.msk [vmem:[#allocation4 + $0x4] sm:$0x3] %vm955_vm5, %v986_v7  ;;  %v949_v8 = vmax.f32 %v944_v5, 0.0  ;;  %v2702_v5 = vpack.c.bf16 %v1083_v2, %v1082_v1  ;;  %v1066_v6 = vld [vmem:[%s4124_s3 + $0x370] sm:$0xff]  ;;  %v1067_v7 = vld [vmem:[%s4124_s3 + $0x378] sm:$0xff]  ;;  %v1441_v2 = vld [vmem:[%s4122_s1] sm:$0xff] }
 0x336   :  { %953 = vst.msk [vmem:[#allocation3 + $0x10] sm:$0xff] %vm950_vm4, %v949_v8  ;;  %v2704_v8 = vpack.c.bf16 %v1067_v7, %v1066_v6  ;;  %v1534_v6 = vld [vmem:[%s4125_s4 + $0x110] sm:$0xff]  ;;  %v1535_v7 = vld [vmem:[%s4125_s4 + $0x118] sm:$0xff] }
 0x337   :  { %1343 = vrot.lane.b32.xlu0 %v1341_v10, %s2852_s15  ;;  %v1085_v10 = vld [vmem:[%s4124_s3 + $0x408] sm:$0xff] }
 0x33d   :  { %v1016_v9 = vld [vmem:[#allocation3 + $0x10] sm:$0x3] }
 0x33e   :  { %1017 = vst.msk [vmem:[#allocation4 + $0x8] sm:$0x3] %vm955_vm5, %v1016_v9  ;;  %v1084_v9 = vld [vmem:[%s4124_s3 + $0x400] sm:$0xff] }
 0x3a0   :  { %v983_v11 = vpop.permute.xlu1 %982 }
 0x3a1   :  { %985 = vst.msk [vmem:[#allocation4 + $0x2] sm:$0x3] %vm969_vm6, %v983_v11  ;;  %v967_v12 = vpop.permute.xlu0 %966  ;;  %v2707_v11 = vpack.c.bf16 %v1085_v10, %v1084_v9  ;;  %v1536_v9 = vld [vmem:[%s4125_s4 + $0x120] sm:$0xff]  ;;  %v1537_v10 = vld [vmem:[%s4125_s4 + $0x128] sm:$0xff] }
 0x3a2   :  { %970 = vst.msk [vmem:[#allocation4] sm:$0x3] %vm969_vm6, %v967_v12  ;;  %v1086_v12 = vld [vmem:[%s4124_s3 + $0x410] sm:$0xff] }
 0x3a3   :  { %v2710_v13 = vpack.c.bf16 %v1087_v56, %v1086_v12  ;;  %v2164_v12 = vld [vmem:[%s4124_s3 + $0x4c2] ss:$0 sm:$0xff] }
 0x3a4   :  { %v1013_v15 = vpop.permute.xlu1 %1012 }
 0x3a5   :  { %1015 = vst.msk [vmem:[#allocation4 + $0x6] sm:$0x3] %vm969_vm6, %v1013_v15  ;;  %v998_v16 = vpop.permute.xlu0 %997  ;;  %v2856_v15 = vmov 0.0  }
 0x3a6   :  { %1000 = vst.msk [vmem:[#allocation4 + $0x4] sm:$0x3] %vm969_vm6, %v998_v16  ;;  %v1088_v16 = vld [vmem:[%s4124_s3 + $0x420] sm:$0xff] }
 0x3a9   :  { %v1344_v1 = vpop.permute.xlu0 %1343 }
 0x3ad   :  { %v1018_v21 = vld [vmem:[#allocation4] sm:$0xff] }
 0x3ae   :  { %v1106_v40 = vrot.slane %v1018_v21, %v1105_v20  ;;  %v1099_v24 = vcombine.high %v1018_v21, %v1018_v21  ;;  %v1090_v21 = vld [vmem:[%s4124_s3 + $0x430] sm:$0xff] }
 0x3af   :  { %v2716_v23 = vpack.c.bf16 %v1091_v22, %v1090_v21 }
 0x3b0   :  { %v1114_v27 = vcombine.high %v1106_v40, %v1106_v40  ;;  %v3777_v29 = vrot.slane %v1099_v24, %v1105_v20  ;;  %v2713_v20 = vpack.c.bf16 %v1089_v17, %v1088_v16  ;;  %v1348_v24 = vld [vmem:[%s4124_s3 + $0x440] sm:$0xff]  ;;  %v2165_v17 = vld [vmem:[%s4125_s4 + $0x1b2] ss:$0 sm:$0xff] }
 0x3b1   :  { %v2719_v26 = vpack.c.bf16 %v1349_v25, %v1348_v24 }
 0x3b2   :  { %1193 = vmatprep.mubr.f32.mxu1 %v1114_v27  ;;  %v1115_v32 = vcombine.high %v3777_v29, %v3777_v29  ;;  %v1350_v27 = vld [vmem:[%s4124_s3 + $0x450] sm:$0xff] }
 0x3b3   :  { %1194 = vmatmul.mubr.f32.vlgmr.msra.gmra.mrb[12].mxu1 %v1106_v40  ;;  %v2162_v40 = vld.sshfl [vmem:[#allocation4 + $0x8] sm:$0x3 pattern:$0x76325410] }
 0x3b4   :  { %2677 = vmatpush3.bf16.msra.mxu1 %v2676_v28  ;;  %1263 = vmatprep.mubr.f32.mxu1 %v1115_v32  ;;  %v1351_v28 = vld [vmem:[%s4124_s3 + $0x458] sm:$0xff]  ;;  %v1354_v32 = vld [vmem:[%s4124_s3 + $0x470] sm:$0xff] }
 0x3b5   :  { %2679 = vmatprep.subr.bf16.mxu1 %v2678_v30  ;;  %v1352_v30 = vld [vmem:[%s4124_s3 + $0x460] sm:$0xff]  ;;  %v2728_v50 = vpack.c.bf16 %v1355_v33, %v1354_v32  ;;  %v1648_v32 = vld [vmem:[%s4125_s4 + $0x158] sm:$0xff] }
 0x3b6   :  { %v2725_v31 = vpack.c.bf16 %v1353_v19, %v1352_v30 }
 0x3b8   :  { %2681 = vmatpush3.bf16.msra.mxu1 %v2680_v34  ;;  %v1356_v34 = vld [vmem:[%s4124_s3 + $0x480] sm:$0xff] }
 0x3b9   :  { %2683 = vmatprep.subr.bf16.mxu1 %v2682_v35  ;;  %v1357_v35 = vld [vmem:[%s4124_s3 + $0x488] sm:$0xff] }
 0x3ba   :  { %v2731_v36 = vpack.c.bf16 %v1357_v35, %v1356_v34  ;;  %v1650_v34 = vld [vmem:[%s4125_s4 + $0x168] sm:$0xff]  ;;  %v1724_v35 = vld [vmem:[%s4125_s4 + $0x170] sm:$0xff] }
 0x3bc   :  { %2685 = vmatpush3.bf16.msra.mxu1 %v2684_v39  ;;  %v1360_v39 = vld [vmem:[%s4124_s3 + $0x4a0] sm:$0xff] }
 0x3bd   :  { %2687 = vmatprep.subr.bf16.mxu1 %v2686_v41  ;;  %v1361_v41 = vld [vmem:[%s4124_s3 + $0x4a8] sm:$0xff] }
 0x3be   :  { %v2737_v42 = vpack.c.bf16 %v1361_v41, %v1360_v39  ;;  %v1727_v39 = vld [vmem:[%s4125_s4 + $0x188] sm:$0xff] }
 0x3c0   :  { %2689 = vmatpush3.bf16.msra.mxu1 %v2688_v46  ;;  %v1443_v46 = vld [vmem:[%s4125_s4 + $0x100] sm:$0xff] }
 0x3c1   :  { %2691 = vmatprep.subr.bf16.mxu1 %v2690_v47  ;;  %v1444_v47 = vld [vmem:[%s4125_s4 + $0x108] sm:$0xff] }
 0x3c2   :  { %v2742_v48 = vpack.c.bf16 %v1444_v47, %v1443_v46 }
 0x3c4   :  { %2693 = vmatpush3.bf16.msra.mxu1 %v2692_v53  ;;  %v2161_v53 = vld [vmem:[%s4124_s3 + $0x4c1] ss:$0 sm:$0xff] }
 0x3c5   :  { %2695 = vmatprep.subr.bf16.mxu1 %v2694_v54 }
 0x3c8   :  { %2697 = vmatpush3.bf16.msra.mxu1 %v2696_v61 }
 0x3c9   :  { %2699 = vmatprep.subr.bf16.mxu1 %v2698_v62 }
 0x3cc   :  { %2701 = vmatpush3.bf16.msra.mxu1 %v2700_v4 }
 0x3cd   :  { %2703 = vmatprep.subr.bf16.mxu1 %v2702_v5  ;;  %v1442_v5 = vld [vmem:[%s4122_s1 + $0x8] sm:$0xff] }
 0x3d0   :  { %2705 = vmatpush3.bf16.msra.mxu1 %v2704_v8  ;;  %v2746_v8 = vpack.c.bf16 %v1535_v7, %v1534_v6 }
 0x3d1   :  { %2706 = vmatprep.subr.bf16.mxu1 %v2850_v3 }
 0x3d3   :  { %1264 = vmatmul.mubr.f32.vlgmr.msra.gmra.mrb[14].mxu1 %v3777_v29  ;;  %v2722_v29 = vpack.c.bf16 %v1351_v28, %v1350_v27  ;;  %v1645_v28 = vld [vmem:[%s4125_s4 + $0x140] sm:$0xff] }
 0x3d4   :  { %2708 = vmatpush3.bf16.msra.mxu1 %v2707_v11  ;;  %2421 = vmatprep.mubr.msk.f32.mxu1 %vm2855_vm7, %v2856_v15  ;;  %v2750_v11 = vpack.c.bf16 %v1537_v10, %v1536_v9 }
 0x3d5   :  { %2709 = vmatprep.subr.bf16.mxu1 %v2850_v3 }
 0x3d8   :  { %2711 = vmatpush3.bf16.msra.mxu1 %v2710_v13 }
 0x3d9   :  { %2712 = vmatprep.subr.bf16.mxu1 %v2850_v3 }
 0x3dc   :  { %2714 = vmatpush3.bf16.msra.mxu1 %v2713_v20 }
 0x3dd   :  { %2715 = vmatprep.subr.bf16.mxu1 %v2850_v3 }
 0x3e0   :  { %2717 = vmatpush3.bf16.msra.mxu1 %v2716_v23  ;;  %v1643_v23 = vld [vmem:[%s4125_s4 + $0x130] sm:$0xff] }
 0x3e1   :  { %2718 = vmatprep.subr.bf16.mxu1 %v2850_v3 }
 0x3e3   :  { %2422 = vmatmul.mubr.msk.f32.vlgmr.msra.gmra.mrb[16].mxu1 %vm950_vm4, %v2162_v40  ;;  %v1644_v40 = vld [vmem:[%s4125_s4 + $0x138] sm:$0xff] }
 0x3e4   :  { %2456 = vmatprep.mubr.msk.f32.mxu1 %vm2855_vm7, %v2856_v15  ;;  %2720 = vmatpush3.bf16.msra.mxu1 %v2719_v26  ;;  %v2755_v26 = vpack.c.bf16 %v1644_v40, %v1643_v23  ;;  %v2857_v23 = vmov 0   ;;  %v2184_v40 = vld [vmem:[%s4125_s4 + $0x1b6] ss:$0 sm:$0xff] }
 0x3e5   :  { %2721 = vmatprep.subr.bf16.mxu1 %v2850_v3  ;;  %2798 = vset.pattern.permute.xlu1 %v2857_v23 }
 0x3e6   :  { %2797 = vset.pattern.permute.xlu0 %v2857_v23 }
 0x3e8   :  { %2723 = vmatpush3.bf16.msra.mxu1 %v2722_v29  ;;  %v1646_v29 = vld [vmem:[%s4125_s4 + $0x148] sm:$0xff] }
 0x3e9   :  { %2724 = vmatprep.subr.bf16.mxu1 %v2850_v3  ;;  %v2758_v30 = vpack.c.bf16 %v1646_v29, %v1645_v28  ;;  %v2033_v29 = vmul.u32 8, %v3762_v18 }
 0x3ec   :  { %2726 = vmatpush3.bf16.msra.mxu1 %v2725_v31  ;;  %v1647_v31 = vld [vmem:[%s4125_s4 + $0x150] sm:$0xff] }
 0x3ed   :  { %2727 = vmatprep.subr.bf16.mxu1 %v2850_v3  ;;  %v2761_v33 = vpack.c.bf16 %v1648_v32, %v1647_v31  ;;  %v2035_v31 = vadd.s32 8, %v2033_v29 }
 0x3f0   :  { %2729 = vmatpush3.bf16.msra.mxu1 %v2728_v50  ;;  %v1649_v50 = vld [vmem:[%s4125_s4 + $0x160] sm:$0xff] }
 0x3f1   :  { %2730 = vmatprep.subr.bf16.mxu1 %v2850_v3  ;;  %v2764_v37 = vpack.c.bf16 %v1650_v34, %v1649_v50 }
 0x3f4   :  { %2732 = vmatpush3.bf16.msra.mxu1 %v2731_v36  ;;  %v1725_v36 = vld [vmem:[%s4125_s4 + $0x178] sm:$0xff] }
 0x3f5   :  { %2733 = vmatprep.subr.bf16.mxu1 %v2850_v3  ;;  %v2766_v58 = vpack.c.bf16 %v1725_v36, %v1724_v35 }
 0x3f8   :  { %2735 = vmatpush3.bf16.msra.mxu1 %v2734_v38  ;;  %v1726_v38 = vld [vmem:[%s4125_s4 + $0x180] sm:$0xff] }
 0x3f9   :  { %2736 = vmatprep.subr.bf16.mxu1 %v2850_v3  ;;  %v2770_v41 = vpack.c.bf16 %v1727_v39, %v1726_v38 }
 0x3fc   :  { %2738 = vmatpush3.bf16.msra.mxu1 %v2737_v42  ;;  %v4033_v42 = vand.u32 127, %v1103_v14 }
 0x3fd   :  { %2739 = vmatprep.subr.bf16.mxu1 %v2850_v3 }
 0x3fe   :  { %v1631_v43 = vmul.u32 8, %v4033_v42  ;;  %v2024_v28 = vadd.s32 8, %v4033_v42  ;;  %vm2016_vm3 = vcmp.eq.s32.totalorder %v3762_v18, %v4033_v42 }
 0x400   :  { %2741 = vmatpush3.bf16.msra.mxu1 %v2740_v45  ;;  %v1634_v44 = vadd.s32 8, %v1631_v43  ;;  %v2168_v45 = vld [vmem:[%s4125_s4 + $0x1b3] ss:$0 sm:$0xff]  ;;  %vm1632_vm9 = vcmp.ge.s32.totalorder %v3762_v18, %v1631_v43 }
 0x401   :  { %2743 = vmatprep.subr.bf16.mxu1 %v2742_v48 }
 0x402   :  { %vm1635_vm10 = vcmp.lt.s32.totalorder %v3762_v18, %v1634_v44 }
 0x403   :  { %vm1637_vm11 = vmand %vm1632_vm9, %vm1635_vm10 }
 0x404   :  { %v2171_v14 = vsel %vm1637_vm11, 1.0, %v2856_v15 }
 0x486   :  { %v2304_v49 = vpop.f32.mrb[12].mxu1 }
 0x487   :  { %v2305_v51 = vpop.f32.mrb[13].mxu1 }
 0x488   :  { %v2306_v52 = vadd.f32 %v2305_v51, %v2304_v49 }
 0x48a   :  { %v1196_v57 = vadd.f32 %v2306_v52, %v2161_v53  ;;  %v4044_v53 = vadd.s32 8, %v3762_v18 }
 0x48c   :  { %vm1633_vm13 = vcmp.ge.s32.totalorder %v4044_v53, %v1631_v43  ;;  %vm1636_vm14 = vcmp.lt.s32.totalorder %v4044_v53, %v1634_v44  ;;  %vm2017_vm2 = vcmp.eq.s32.totalorder %v4044_v53, %v4033_v42 }
 0x48d   :  { %vm1638_vm15 = vmand %vm1633_vm13, %vm1636_vm14 }
 0x4a6   :  { %v2339_v54 = vpop.f32.mrb[14].mxu1 }
 0x4a7   :  { %v2340_v55 = vpop.f32.mrb[15].mxu1 }
 0x4a8   :  { %v2341_v59 = vadd.f32 %v2340_v55, %v2339_v54  ;;  %v1904_v54 = vld [vmem:[%s4125_s4 + $0x190] sm:$0xff]  ;;  %v1905_v55 = vld [vmem:[%s4125_s4 + $0x198] sm:$0xff] }
 0x4aa   :  { %v1266_v60 = vadd.f32 %v2341_v59, %v1196_v57  ;;  %v2774_v57 = vpack.c.bf16 %v1905_v55, %v1904_v54 }
 0x4b6   :  { %v1335_v61 = vpop.f32.mrb[16].mxu1 }
 0x4b7   :  { %v1336_v62 = vadd.f32 %v1335_v61, %v1266_v60  ;;  %v2423_v63 = vpop.f32.mrb[17].mxu1  ;;  %v2172_v60 = vsel %vm1638_vm15, 1.0, %v2856_v15 }
 0x4b8   :  { %v1907_v63 = vld [vmem:[%s4125_s4 + $0x1a8] sm:$0xff] }
 0x4b9   :  { %v1339_v0 = vmax.f32 %v1336_v62, 0.0  ;;  %v1906_v62 = vld [vmem:[%s4125_s4 + $0x1a0] sm:$0xff] }
 0x4bb   :  { %1340 = vst.msk [vmem:[#allocation5] sm:$0x3] %vm955_vm5, %v1339_v0  ;;  %v2778_v0 = vpack.c.bf16 %v1907_v63, %v1906_v62 }
 0x4bc   :  { %1346 = vst.msk [vmem:[#allocation5] sm:$0x3] %vm969_vm6, %v1344_v1  ;;  %v2179_v1 = vld [vmem:[%s4125_s4 + $0x1b4] ss:$0 sm:$0xff] }
 0x4c3   :  { %v1347_v4 = vld [vmem:[#allocation5] sm:$0x3] }
 0x4c4   :  { %2457 = vmatmul.mubr.f32.vlgmr.msra.gmra.mrb[18].mxu1 %v1347_v4 }
 0x4c5   :  { %2745 = vmatpush3.bf16.msra.mxu1 %v2742_v48  ;;  %2463 = vmatprep.mubr.msk.f32.mxu1 %vm1450_vm8, %v1441_v2 }
 0x4c6   :  { %2747 = vmatprep.subr.bf16.mxu1 %v2746_v8 }
 0x4c8   :  { %2464 = vmatmul.mubr.msk.f32.vlgmr.msra.gmra.mrb[20].mxu1 %vm1450_vm8, %v1442_v5 }
 0x4c9   :  { %2749 = vmatpush3.bf16.msra.mxu1 %v2746_v8 }
 0x4ca   :  { %2751 = vmatprep.subr.bf16.mxu1 %v2750_v11 }
 0x4cd   :  { %2753 = vmatpush3.bf16.msra.mxu1 %v2750_v11 }
 0x4ce   :  { %2754 = vmatprep.subr.bf16.mxu1 %v2850_v3 }
 0x597   :  { %v1435_v56 = vpop.f32.mrb[18].mxu1 }
 0x598   :  { %v1436_v13 = vadd.f32 %v2164_v12, %v1435_v56  ;;  %v2458_v16 = vpop.f32.mrb[19].mxu1  ;;  %v2183_v56 = vld [vmem:[%s4125_s4 + $0x1b0] ss:$0 sm:$0xff] }
 0x59a   :  { %2800 = vtanh.f32 %v1436_v13 }
 0x59b   :  { %v2465_v20 = vpop.f32.mrb[20].mxu1 }
 0x59c   :  { %v1529_v21 = vadd.f32 %v2465_v20, %v2165_v17  ;;  %v1523_v22 = vpop.f32.mrb[21].mxu1 }
 0x59d   :  { %v1524_v24 = vadd.f32 %v2165_v17, %v1523_v22 }
 0x59e   :  { %v1533_v27 = vmax.f32 %v1529_v21, 0.0 }
 0x59f   :  { %v1532_v25 = vmax.f32 %v1524_v24, 0.0 }
 0x5a1   :  { %2474 = vmatprep.mubr.msk.f32.mxu1 %vm510_vm0, %v1532_v25 }
 0x5a2   :  { %2475 = vmatmul.mubr.msk.f32.vlgmr.msra.gmra.mrb[22].mxu1 %vm510_vm0, %v1533_v27 }
 0x5a3   :  { %2756 = vmatpush3.bf16.msra.mxu1 %v2755_v26  ;;  %2493 = vmatprep.mubr.msk.f32.mxu1 %vm2855_vm7, %v2856_v15 }
 0x5a4   :  { %v2801_v19 = vpop.eup %2800  ;;  %2757 = vmatprep.subr.bf16.mxu1 %v2850_v3 }
 0x5a5   :  { %1440 = vst.msk [vmem:[#allocation8] sm:$0x3] %vm955_vm5, %v2801_v19  ;;  %vm2036_vm5 = vcmp.lt.s32.totalorder %v4033_v42, %v2035_v31 }
 0x5a7   :  { %2759 = vmatpush3.bf16.msra.mxu1 %v2758_v30  ;;  %v2186_v30 = vsel %vm2017_vm2, 1.0, %v2856_v15 }
 0x5a8   :  { %2760 = vmatprep.subr.bf16.mxu1 %v2850_v3 }
 0x5ab   :  { %2762 = vmatpush3.bf16.msra.mxu1 %v2761_v33  ;;  %v2185_v33 = vsel %vm2016_vm3, 1.0, %v2856_v15 }
 0x5ac   :  { %2763 = vmatprep.subr.bf16.mxu1 %v2850_v3 }
 0x5af   :  { %2765 = vmatpush3.bf16.msra.mxu1 %v2764_v37 }
 0x5b0   :  { %2767 = vmatprep.subr.bf16.mxu1 %v2766_v58 }
 0x5b2   :  { %2494 = vmatmul.mubr.msk.f32.vlgmr.msra.gmra.mrb[24].mxu1 %vm950_vm4, %v2801_v19  ;;  %vm2034_vm4 = vcmp.ge.s32.totalorder %v4033_v42, %v2033_v29 }
 0x5b3   :  { %2769 = vmatpush3.bf16.msra.mxu1 %v2766_v58  ;;  %vm2037_vm6 = vmand %vm2034_vm4, %vm2036_vm5 }
 0x5b4   :  { %2771 = vmatprep.subr.bf16.mxu1 %v2770_v41  ;;  %v2188_v58 = vsel %vm2037_vm6, 1.0, %v2856_v15 }
 0x5b7   :  { %2773 = vmatpush3.bf16.msra.mxu1 %v2770_v41 }
 0x675   :  { %v2476_v46 = vpop.f32.mrb[22].mxu1 }
 0x676   :  { %v1621_v47 = vadd.f32 %v2476_v46, %v2168_v45  ;;  %v1615_v48 = vpop.f32.mrb[23].mxu1 }
 0x677   :  { %v1616_v49 = vadd.f32 %v2168_v45, %v1615_v48 }
 0x678   :  { %v1625_v52 = vmax.f32 %v1621_v47, 0.0 }
 0x679   :  { %v1624_v51 = vmax.f32 %v1616_v49, 0.0 }
 0x67b   :  { %2504 = vmatprep.mubr.msk.f32.mxu1 %vm510_vm0, %v1624_v51 }
 0x67c   :  { %2505 = vmatmul.mubr.msk.f32.vlgmr.msra.gmra.mrb[26].mxu1 %vm510_vm0, %v1625_v52 }
 0x67d   :  { %2509 = vmatprep.mubr.msk.f32.mxu1 %vm1809_vm12, %v2171_v14 }
 0x685   :  { %v1720_v59 = vpop.f32.mrb[24].mxu1 }
 0x686   :  { %v2495_v61 = vpop.f32.mrb[25].mxu1  ;;  %2507 = vmatprep.subr.msk.mxu1 %vm1816_vm1, %v1720_v59 }
 0x687   :  { %2508 = vmatpush3.msk.msra.mxu1 %vm1816_vm1, %v1720_v59 }
 0x688   :  { %2510 = vmatmul.mubr.msk.f32.vlgmr.msra.gmra.mrb[26].mxu1 %vm1809_vm12, %v2172_v60  ;;  %2775 = vmatprep.subr.bf16.mxu1 %v2774_v57 }
 0x689   :  { %2777 = vmatpush3.bf16.msra.mxu1 %v2774_v57 }
 0x68a   :  { %2779 = vmatprep.subr.bf16.mxu1 %v2778_v0 }
 0x68d   :  { %2781 = vmatpush3.bf16.msra.mxu1 %v2778_v0 }
 0x68e   :  { %2782 = vmatprep.subr.bf16.mxu1 %v2850_v3  ;;  %v2180_v3 = vld [vmem:[%s4125_s4 + $0x1b5] ss:$0 sm:$0xff]  ;;  %s2858_s4 = smov [#allocation8]  }
 0x68f   :  { %s2143_s17 = sshll.u32 %s2858_s4, 4  ;;  %s2144_s17 = int_to_ptr.vmem [resolvable:$true] %s2143_s17 }
 0x690   :  { %s2802_s18 = scalar_lea.vmem %s2144_s17, 32  ;;  %p2807_p1 = scmp.lt.s32.totalorder %s2144_s17, %s2144_s17 }
 0x691   :  { %p2803_p0 = scmp.ne.s32.totalorder %s2144_s17, %s2802_s18  ;;  %p2808_p2 = scmp.lt.s32.totalorder %s2802_s18, %s2802_s18 }
 0x693   :  { %p2809_p3 = por %p2808_p2, %p2807_p1 }
 0x695   :  { %p2810_p4 = pnand %p2809_p3, %p2803_p0 }
 0x75b   :  { %v2511_v2 = vpop.f32.mrb[26].mxu1 }
 0x75c   :  { %v1901_v4 = vadd.f32 %v2511_v2, %v2179_v1  ;;  %v1886_v5 = vpop.f32.mrb[27].mxu1 }
 0x75d   :  { %v1900_v6 = vadd.f32 %v2179_v1, %v1886_v5 }
 0x75e   :  { %v1903_v8 = vmax.f32 %v1901_v4, 0.0 }
 0x75f   :  { %v1902_v7 = vmax.f32 %v1900_v6, 0.0 }
 0x761   :  { %2520 = vmatprep.mubr.msk.f32.mxu1 %vm510_vm0, %v1902_v7 }
 0x762   :  { %2521 = vmatmul.mubr.msk.f32.vlgmr.msra.gmra.mrb[28].mxu1 %vm510_vm0, %v1903_v8 }
 0x763   :  { %2527 = vmatprep.mubr.msk.f32.mxu1 %vm2855_vm7, %v2856_v15 }
 0x835   :  { %v2522_v9 = vpop.f32.mrb[28].mxu1 }
 0x836   :  { %v1991_v10 = vadd.f32 %v2522_v9, %v2180_v3  ;;  %v1985_v11 = vpop.f32.mrb[29].mxu1 }
 0x837   :  { %v1986_v12 = vadd.f32 %v2180_v3, %v1985_v11 }
 0x838   :  { %v1995_v13 = vmax.f32 %v1991_v10, 0.0 }
 0x839   :  { %v1994_v16 = vmax.f32 %v1986_v12, 0.0 }
 0x83a   :  { %v2002_v17 = vmul.f32 %v2183_v56, %v1995_v13 }
 0x83b   :  { %v2001_v20 = vmul.f32 %v2183_v56, %v1994_v16 }
 0x83c   :  { %v2006_v21 = vsel %vm510_vm0, %v2002_v17, 0.0 }
 0x83d   :  { %2007 = vadd.xlane.f32.xlu0 %v2006_v21  ;;  %v2003_v22 = vsel %vm510_vm0, %v2001_v20, 0.0  ;;  %vm2026_vm0 = vcmp.eq.s32.totalorder %v4044_v53, %v2024_v28 }
 0x83e   :  { %2004 = vadd.xlane.f32.xlu1 %v2003_v22  ;;  %v2187_v19 = vsel %vm2026_vm0, 1.0, %v2856_v15 }
 0x83f   :  { %v2032_v32 = vadd.f32 %v2187_v19, %v2186_v30 }
 0x8ca   :  { %v2008_v24 = vpop.xlane.xlu0 %2007 }
 0x8cb   :  { %v2015_v25 = vadd.f32 %v2184_v40, %v2008_v24  ;;  %v2005_v26 = vpop.xlane.xlu1 %2004 }
 0x8cc   :  { %v2014_v27 = vadd.f32 %v2184_v40, %v2005_v26 }
 0x8cd   :  { %2047 = vperm.xlu1 %2798, %v2015_v25  }
 0x8ce   :  { %2042 = vperm.xlu0 %2797, %v2014_v27  }
 0x94c   :  { %v2048_v50 = vpop.permute.xlu1 %2047 }
 0x94d   :  { %v2051_v34 = vmul.f32 %v2048_v50, %v2032_v32  ;;  %v2043_v35 = vpop.permute.xlu0 %2042 }
 0x94e   :  { %v2050_v36 = vmul.f32 %v2185_v33, %v2043_v35 }
 0x950   :  { %v2783_v37 = vpack.c.bf16 %v2051_v34, %v2050_v36 }
 0x952   :  { %2784 = vmatpush3.bf16.msra.mxu1 %v2783_v37 }
 0x955   :  { %2528 = vmatmul.mubr.msk.f32.vlgmr.msra.gmra.mrb[30].mxu1 %vm1450_vm8, %v2188_v58 }
 0x956   :  { %2813 = shalt.err (!%p2810_p4)
}
 0x957   :  { %s2814_s20 = scalar_lea.hbm %s4127_s6, 32 }
 0x958   :  { %p2815_p5 = scmp.ne.s32.totalorder %s4127_s6, %s2814_s20  ;;  %p2818_p6 = scmp.lt.u32.totalorder %s2814_s20, %s4127_s6 }
 0x95a   :  { %p2820_p7 = pnand %p2818_p6, %p2815_p5 }
 0x95c   :  { %2823 = shalt.err (!%p2820_p7)
}
 0x95d   :  { %2146 = dma.vmem_to_hbm [thread:$0]  %s2144_s17, 32, %s4127_s6, [#allocation9]   ;;  %vm2125_vm7 = vcmask 58368  }
 0x95e   :  { %s2859_s25 = smov [#allocation6]  }
 0x95f   :  { %s2133_s26 = sshll.u32 %s2859_s25, 4  ;;  %s2134_s26 = int_to_ptr.vmem [resolvable:$true] %s2133_s26 }
 0x960   :  { %s2824_s27 = scalar_lea.vmem %s2134_s26, 32  ;;  %p2829_p9 = scmp.lt.s32.totalorder %s2134_s26, %s2134_s26 }
 0x961   :  { %p2825_p8 = scmp.ne.s32.totalorder %s2134_s26, %s2824_s27  ;;  %p2830_p10 = scmp.lt.s32.totalorder %s2824_s27, %s2824_s27 }
 0x963   :  { %p2831_p11 = por %p2830_p10, %p2829_p9 }
 0x965   :  { %p2832_p12 = pnand %p2831_p11, %p2825_p8 }
 0xa28   :  { %v2121_v18 = vpop.f32.mrb[30].mxu1 }
 0xa29   :  { %v2529_v15 = vpop.f32.mrb[31].mxu1  ;;  %2126 = vst.msk [vmem:[#allocation6] sm:$0x3] %vm2125_vm7, %v2121_v18 }
 0xa2a   :  { %2835 = shalt.err (!%p2832_p12)
}
 0xa2b   :  { %s2836_s15 = scalar_lea.hbm %s4126_s5, 32 }
 0xa2c   :  { %p2837_p13 = scmp.ne.s32.totalorder %s4126_s5, %s2836_s15  ;;  %p2840_p0 = scmp.lt.u32.totalorder %s2836_s15, %s4126_s5 }
 0xa2e   :  { %p2842_p1 = pnand %p2840_p0, %p2837_p13 }
 0xa30   :  { %2845 = shalt.err (!%p2842_p1)
}
 0xa31   :  { %2136 = dma.vmem_to_hbm [thread:$0]  %s2134_s26, 32, %s4126_s5, [#allocation7]  }
 0xa32   :  { %2846 = dma.done.wait [#allocation7], 32  }
 0xa33   :  { %2847 = vsyncadd [#allocation7], 4294967264 }
 0xa34   :  { %2848 = dma.done.wait [#allocation9], 32  }
 0xa35   :  { %2849 = vsyncadd [#allocation9], 4294967264 }
 0xa36   :  { %2153 = vsyncpa [#allocation7], 1 }
 0xa37   :  { %2154 = vsyncpa [#allocation9], 1 }

</bundles_post_ra>
